<compile_context>
chip_gen: v6e
topology: v6e:2x2x1
jax: 0.10.0
libtpu: 0.0.40
codegen_flags: <defaults>
</compile_context>

<pallas_src>
import functools

import jax
import jax.numpy as jnp
from jax.experimental import pallas as pl
from jax.experimental.pallas import tpu as pltpu

_SUBLANE = 8
_LANE = 128

# Matmul operand dtype.  f32 keeps the 1e-4 correctness check tight at demo
# sizes; on v6e/v7x with realistic H set to jnp.bfloat16 to hit the bf16 MXU
# peak and halve weight DMA / VMEM (accumulation stays f32 via
# preferred_element_type; elementwise gate math stays f32).
MATMUL_DTYPE = jnp.float32


def _round_up(x, m):
    return (x + m - 1) // m * m


def _pad_gate_cols(w, H, Hp):
    """Pad the trailing (4*H) gate axis to (4*Hp), zero-filling per gate block."""
    lead = w.shape[:-1]
    w4 = w.reshape(lead + (4, H))
    w4 = jnp.pad(w4, [(0, 0)] * len(lead) + [(0, 0), (0, Hp - H)])
    return w4.reshape(lead + (4 * Hp,))


# ----------------------------------------------------------------------------
# Pallas kernel: one grid step == one LSTM direction over the full sequence
# ----------------------------------------------------------------------------
def _lstm_dir_kernel(len_ref, xg_ref, whh_ref, y_ref, h_scr, c_scr, *, seq_len):
    """
    len_ref : (Bp, 1)        int32 sequence lengths (padded rows = 0)
    xg_ref  : (T, Bp, 4*Hp)  precomputed x @ W_ih^T + b (f32), gate-padded
    whh_ref : (Hp, 4*Hp)     W_hh^T, gate-padded
    y_ref   : (T, Bp, Hp)    per-timestep hidden output (padded positions -> 0)
    """
    is_rev = pl.program_id(0) > 0        # PyTorch: direction 1 runs reversed
    lens = len_ref[...]                  # (Bp, 1) int32, loaded once
    hp = h_scr.shape[1]

    h_scr[...] = jnp.zeros_like(h_scr)
    c_scr[...] = jnp.zeros_like(c_scr)

    def step(s, carry):
        t = jnp.where(is_rev, seq_len - 1 - s, s)          # actual time index
        xg = xg_ref[t]                                     # (Bp, 4Hp)
        h = h_scr[...]
        c = c_scr[...]
        # Only the recurrent projection is inside the time loop.
        gates = xg + jnp.dot(h.astype(whh_ref.dtype), whh_ref[...],
                             preferred_element_type=jnp.float32)
        # Lane-aligned gate slices: each slice covers whole 128-lane vregs.
        i_g = jax.nn.sigmoid(gates[:, 0 * hp:1 * hp])
        f_g = jax.nn.sigmoid(gates[:, 1 * hp:2 * hp])
        g_g = jnp.tanh(gates[:, 2 * hp:3 * hp])
        o_g = jax.nn.sigmoid(gates[:, 3 * hp:4 * hp])
        c_new = f_g * c + i_g * g_g
        h_new = o_g * jnp.tanh(c_new)
        valid = t < lens                                   # (Bp, 1) bool
        # Packed-sequence semantics: state advances only while t < length[b].
        h_scr[...] = jnp.where(valid, h_new, h)
        c_scr[...] = jnp.where(valid, c_new, c)
        y_ref[t] = jnp.where(valid, h_new, 0.0)            # pad_packed -> zeros
        return carry

    jax.lax.fori_loop(0, seq_len, step, 0, unroll=True)


def bilstm_layer(x_tbi, lens_pad_2d, layer_params, H):
    """One (bi)LSTM layer on time-major (T, B, In) f32 input -> (T, B, ndir*H)."""
    T, B, In = x_tbi.shape
    ndir = len(layer_params)
    Hp = _round_up(H, _LANE)       # lane-aligned per-gate width
    Bp = _round_up(B, _SUBLANE)    # sublane-aligned batch

    xg_dirs, whh_dirs = [], []
    for (wih, whh, bih, bhh) in layer_params:
        wih_t = _pad_gate_cols(jnp.asarray(wih).T, H, Hp)            # (In, 4Hp)
        bias = _pad_gate_cols((bih + bhh).reshape(1, -1), H, Hp)     # (1, 4Hp)
        # Hoisted input projection (all T*B rows at once, bias folded in).
        xg = jnp.dot(x_tbi.astype(MATMUL_DTYPE), wih_t.astype(MATMUL_DTYPE),
                     preferred_element_type=jnp.float32) + bias      # (T,B,4Hp)
        xg = jnp.pad(xg, ((0, 0), (0, Bp - B), (0, 0)))              # (T,Bp,4Hp)
        xg_dirs.append(xg)

        whh_t = _pad_gate_cols(jnp.asarray(whh).T, H, Hp)            # (H, 4Hp)
        whh_t = jnp.pad(whh_t, ((0, Hp - H), (0, 0)))                # (Hp, 4Hp)
        whh_dirs.append(whh_t.astype(MATMUL_DTYPE))

    xg_all = jnp.stack(xg_dirs, axis=0)     # (ndir, T, Bp, 4Hp)
    whh_all = jnp.stack(whh_dirs, axis=0)   # (ndir, Hp, 4Hp)

    y = pl.pallas_call(
        functools.partial(_lstm_dir_kernel, seq_len=T),
        out_shape=jax.ShapeDtypeStruct((ndir, T, Bp, Hp), jnp.float32),
        grid=(ndir,),
        in_specs=[
            pl.BlockSpec((Bp, 1), lambda d: (0, 0)),                      # lengths
            pl.BlockSpec((None, T, Bp, 4 * Hp), lambda d: (d, 0, 0, 0)),  # x-gates
            pl.BlockSpec((None, Hp, 4 * Hp), lambda d: (d, 0, 0)),        # W_hh^T
        ],
        out_specs=pl.BlockSpec((None, T, Bp, Hp), lambda d: (d, 0, 0, 0)),
        scratch_shapes=[
            pltpu.VMEM((Bp, Hp), jnp.float32),     # h state
            pltpu.VMEM((Bp, Hp), jnp.float32),     # c state
        ],
        compiler_params=pltpu.CompilerParams(
            # Directions are independent -> parallel axis (both TCs on v7x).
            dimension_semantics=("parallel",)),
    )(lens_pad_2d, xg_all, whh_all)

    # Un-pad and merge directions -> (T, B, ndir*H).
    y = y[:, :, :B, :H]
    return jnp.concatenate([y[d] for d in range(ndir)], axis=-1)


# ----------------------------------------------------------------------------
# Model forward (XLA glue: embedding gather, per-layer merge, final linear)
# ----------------------------------------------------------------------------
def seq_classifier_forward(text, lengths, emb_table, lstm_params, ll_w, ll_b):
    B, T = text.shape
    H = lstm_params[0][0][1].shape[1]                        # whh: (4H, H)
    Bp = _round_up(B, _SUBLANE)

    x = jnp.asarray(emb_table)[text]                         # (B, T, E) gather
    h_in = jnp.transpose(x, (1, 0, 2)).astype(jnp.float32)   # (T, B, E) time-major
    lens_pad = jnp.pad(lengths.astype(jnp.int32), (0, Bp - B)).reshape(Bp, 1)

    for layer in lstm_params:
        h_in = bilstm_layer(h_in, lens_pad, layer, H)        # (T, B, ndir*H)

    # pad_packed_sequence gives time dim = max(lengths); [:, -1, :] is that
    # index.  Take it from the time-major tensor (no full transpose).
    last = jnp.take(h_in, jnp.max(lengths) - 1, axis=0)      # (B, ndir*H)
    # Tiny (B,2H)x(2H,C) linear: launch overhead of a Pallas call exceeds its
    # compute and its C-lane output would be fully-masked stores -> plain XLA.
    return jnp.dot(last, ll_w.T, preferred_element_type=jnp.float32) + ll_b


# ----------------------------------------------------------------------------
# Pure-JAX reference (packed bi-LSTM semantics) for correctness check
# ----------------------------------------------------------------------------
def ref_forward(text, lengths, emb_table, lstm_params, ll_w, ll_b):
    x = jnp.asarray(emb_table)[text]                         # (B, T, E)
    B, T, _ = x.shape
    lens = jnp.asarray(lengths)

    def cell(x_t, h, c, wih, whh, b):
        gates = x_t @ wih.T + h @ whh.T + b
        i, f, g, o = jnp.split(gates, 4, axis=-1)
        c = jax.nn.sigmoid(f) * c + jax.nn.sigmoid(i) * jnp.tanh(g)
        h = jax.nn.sigmoid(o) * jnp.tanh(c)
        return h, c

    layer_in = x
    for layer in lstm_params:
        outs = []
        for d, (wih, whh, bih, bhh) in enumerate(layer):
            H = whh.shape[1]
            b = bih + bhh
            h = jnp.zeros((B, H), jnp.float32)
            c = jnp.zeros((B, H), jnp.float32)
            y = jnp.zeros((B, T, H), jnp.float32)
            time_order = range(T - 1, -1, -1) if d == 1 else range(T)
            for t in time_order:
                m = (t < lens).astype(jnp.float32)[:, None]
                h_new, c_new = cell(layer_in[:, t, :], h, c, wih, whh, b)
                h = m * h_new + (1 - m) * h
                c = m * c_new + (1 - m) * c
                y = y.at[:, t, :].set(m * h_new)
            outs.append(y)
        layer_in = jnp.concatenate(outs, axis=-1)
    last = layer_in[:, jnp.max(lens) - 1, :]
    return last @ ll_w.T + ll_b


# ----------------------------------------------------------------------------
# Deterministic parameter init (synthetic; shapes match the nn.Module)
# ----------------------------------------------------------------------------
def init_params(key, vocab, E, H, num_layers, bidirectional, num_class):
    ndir = 2 if bidirectional else 1
    s = 1.0 / jnp.sqrt(jnp.float32(H))
    key, ke = jax.random.split(key)
    emb = jax.random.normal(ke, (vocab, E), jnp.float32) * 0.1

    lstm_params = []
    inp = E
    for _ in range(num_layers):
        layer = []
        for _ in range(ndir):
            key, k1, k2, k3, k4 = jax.random.split(key, 5)
            wih = jax.random.uniform(k1, (4 * H, inp), jnp.float32, -s, s)
            whh = jax.random.uniform(k2, (4 * H, H), jnp.float32, -s, s)
            bih = jax.random.uniform(k3, (4 * H,), jnp.float32, -s, s)
            bhh = jax.random.uniform(k4, (4 * H,), jnp.float32, -s, s)
            layer.append((wih, whh, bih, bhh))
        lstm_params.append(layer)
        inp = H * ndir

    key, kw, kb = jax.random.split(key, 3)
    sl = 1.0 / jnp.sqrt(jnp.float32(H * 2))
    ll_w = jax.random.uniform(kw, (num_class, H * 2), jnp.float32, -sl, sl)
    ll_b = jax.random.uniform(kb, (num_class,), jnp.float32, -sl, sl)
    return emb, lstm_params, ll_w, ll_b


if __name__ == "__main__":
    B, T, VOCAB, E, H = 4, 8, 30, 32, 32
    NUM_LAYERS, NUM_CLASS = 2, 6

    key = jax.random.PRNGKey(0)
    emb, lstm_params, ll_w, ll_b = init_params(
        key, VOCAB, E, H, NUM_LAYERS, bidirectional=True, num_class=NUM_CLASS)

    key, kt = jax.random.split(key)
    text = jax.random.randint(kt, (B, T), 0, VOCAB, dtype=jnp.int32)
    lengths = jnp.array([8, 5, 8, 3], dtype=jnp.int32)   # variable lengths

    fwd = jax.jit(seq_classifier_forward)
    logits = fwd(text, lengths, emb, lstm_params, ll_w, ll_b)
    logits = jax.block_until_ready(logits)

    ref = ref_forward(text, lengths, emb, lstm_params, ll_w, ll_b)
    assert logits.shape == (B, NUM_CLASS)
    assert jnp.allclose(logits, ref, atol=1e-4, rtol=1e-4), (
        f"mismatch: max abs err {jnp.max(jnp.abs(logits - ref))}")

    print("KERNEL_OK")
</pallas_src>

<mosaic_0001>
module attributes {stable_mosaic.version = 11 : i64} {
  func.func @_lstm_dir_kernel(%arg0: i32, %arg1: memref<8x1xi32, #tpu.memory_space<vmem>>, %arg2: memref<1x8x8x512xf32, #tpu.memory_space<vmem>>, %arg3: memref<1x128x512xf32, #tpu.memory_space<vmem>>, %arg4: memref<1x8x8x128xf32, #tpu.memory_space<vmem>>, %arg5: memref<8x128xf32, #tpu.memory_space<vmem>>, %arg6: memref<8x128xf32, #tpu.memory_space<vmem>>) attributes {dimension_semantics = [#tpu.dimension_semantics<parallel>], iteration_bounds = array<i64: 2>, scalar_prefetch = 0 : i64, scratch_operands = 2 : i64, tpu.core_type = #tpu.core_type<tc>, window_params = [{pipeline_mode = #tpu.pipeline_mode<synchronous>, transform_indices = @transform_0, window_bounds = array<i64: 8, 1>}, {transform_indices = @transform_1, window_bounds = array<i64: 1, 8, 8, 512>}, {transform_indices = @transform_2, window_bounds = array<i64: 1, 128, 512>}, {transform_indices = @transform_3, window_bounds = array<i64: 1, 8, 8, 128>}]} {
    %c0_i32 = arith.constant 0 : i32
    %0 = arith.cmpi sgt, %arg0, %c0_i32 : i32
    %c0 = arith.constant 0 : index
    %c0_0 = arith.constant 0 : index
    %1 = vector.load %arg1[%c0, %c0_0] : memref<8x1xi32, #tpu.memory_space<vmem>>, vector<8x1xi32>
    %cst = arith.constant 0.000000e+00 : f32
    %2 = vector.broadcast %cst : f32 to vector<8x128xf32>
    %c0_1 = arith.constant 0 : index
    %c0_2 = arith.constant 0 : index
    %3 = vector.load %arg5[%c0_1, %c0_2] : memref<8x128xf32, #tpu.memory_space<vmem>>, vector<8x128xf32>
    tpu.vector_store %arg5[%c0_1, %c0_2], %2 {strides = array<i32>} : memref<8x128xf32, #tpu.memory_space<vmem>>, vector<8x128xf32>,
    %cst_3 = arith.constant 0.000000e+00 : f32
    %4 = vector.broadcast %cst_3 : f32 to vector<8x128xf32>
    %c0_4 = arith.constant 0 : index
    %c0_5 = arith.constant 0 : index
    %5 = vector.load %arg6[%c0_4, %c0_5] : memref<8x128xf32, #tpu.memory_space<vmem>>, vector<8x128xf32>
    tpu.vector_store %arg6[%c0_4, %c0_5], %4 {strides = array<i32>} : memref<8x128xf32, #tpu.memory_space<vmem>>, vector<8x128xf32>,
    %c0_i32_6 = arith.constant 0 : i32
    %c7_i32 = arith.constant 7 : i32
    %6 = arith.subi %c7_i32, %c0_i32_6 : i32
    %7 = arith.select %0, %6, %c0_i32_6 : i32
    %c0_7 = arith.constant 0 : index
    %8 = arith.index_cast %7 : i32 to index
    %c0_8 = arith.constant 0 : index
    %c0_9 = arith.constant 0 : index
    %9 = vector.load %arg2[%c0_7, %8, %c0_8, %c0_9] : memref<1x8x8x512xf32, #tpu.memory_space<vmem>>, vector<1x1x8x512xf32>
    %10 = vector.shape_cast %9 : vector<1x1x8x512xf32> to vector<8x512xf32>
    %c0_10 = arith.constant 0 : index
    %c0_11 = arith.constant 0 : index
    %11 = vector.load %arg5[%c0_10, %c0_11] : memref<8x128xf32, #tpu.memory_space<vmem>>, vector<8x128xf32>
    %c0_12 = arith.constant 0 : index
    %c0_13 = arith.constant 0 : index
    %12 = vector.load %arg6[%c0_12, %c0_13] : memref<8x128xf32, #tpu.memory_space<vmem>>, vector<8x128xf32>
    %c0_14 = arith.constant 0 : index
    %c0_15 = arith.constant 0 : index
    %c0_16 = arith.constant 0 : index
    %13 = vector.load %arg3[%c0_14, %c0_15, %c0_16] : memref<1x128x512xf32, #tpu.memory_space<vmem>>, vector<1x128x512xf32>
    %14 = vector.shape_cast %13 : vector<1x128x512xf32> to vector<128x512xf32>
    %cst_17 = arith.constant dense<0.000000e+00> : vector<8x512xf32>
    %15 = tpu.matmul %11, %14, %cst_17 {dimension_numbers = #tpu.dot_dimension_numbers<[1], [0], [0], [1], [0, 0, 1, 1], [], []>} : vector<8x128xf32>, vector<128x512xf32>, vector<8x512xf32> -> vector<8x512xf32>
    %16 = arith.addf %10, %15 : vector<8x512xf32>
    %17 = vector.extract_strided_slice %16 {offsets = [0, 0], sizes = [8, 128], strides = [1, 1]} : vector<8x512xf32> to vector<8x128xf32>
    %18 = arith.negf %17 : vector<8x128xf32>
    %19 = math.exp %18 : vector<8x128xf32>
    %cst_18 = arith.constant 1.000000e+00 : f32
    %20 = vector.broadcast %cst_18 : f32 to vector<8x128xf32>
    %21 = arith.addf %20, %19 : vector<8x128xf32>
    %22 = arith.divf %20, %21 : vector<8x128xf32>
    %23 = vector.extract_strided_slice %16 {offsets = [0, 128], sizes = [8, 128], strides = [1, 1]} : vector<8x512xf32> to vector<8x128xf32>
    %24 = arith.negf %23 : vector<8x128xf32>
    %25 = math.exp %24 : vector<8x128xf32>
    %cst_19 = arith.constant 1.000000e+00 : f32
    %26 = vector.broadcast %cst_19 : f32 to vector<8x128xf32>
    %27 = arith.addf %26, %25 : vector<8x128xf32>
    %28 = arith.divf %26, %27 : vector<8x128xf32>
    %29 = vector.extract_strided_slice %16 {offsets = [0, 256], sizes = [8, 128], strides = [1, 1]} : vector<8x512xf32> to vector<8x128xf32>
    %30 = math.tanh %29 : vector<8x128xf32>
    %31 = vector.extract_strided_slice %16 {offsets = [0, 384], sizes = [8, 128], strides = [1, 1]} : vector<8x512xf32> to vector<8x128xf32>
    %32 = arith.negf %31 : vector<8x128xf32>
    %33 = math.exp %32 : vector<8x128xf32>
    %cst_20 = arith.constant 1.000000e+00 : f32
    %34 = vector.broadcast %cst_20 : f32 to vector<8x128xf32>
    %35 = arith.addf %34, %33 : vector<8x128xf32>
    %36 = arith.divf %34, %35 : vector<8x128xf32>
    %37 = arith.mulf %28, %12 : vector<8x128xf32>
    %38 = arith.mulf %22, %30 : vector<8x128xf32>
    %39 = arith.addf %37, %38 : vector<8x128xf32>
    %40 = math.tanh %39 : vector<8x128xf32>
    %41 = arith.mulf %36, %40 : vector<8x128xf32>
    %42 = vector.broadcast %7 : i32 to vector<8x1xi32>
    %43 = arith.cmpi slt, %42, %1 : vector<8x1xi32>
    %44 = vector.shape_cast %43 : vector<8x1xi1> to vector<8x1xi1>
    %45 = vector.broadcast %44 : vector<8x1xi1> to vector<8x128xi1>
    %46 = arith.select %45, %41, %11 : vector<8x128xi1>, vector<8x128xf32>
    %c0_21 = arith.constant 0 : index
    %c0_22 = arith.constant 0 : index
    %47 = vector.load %arg5[%c0_21, %c0_22] : memref<8x128xf32, #tpu.memory_space<vmem>>, vector<8x128xf32>
    tpu.vector_store %arg5[%c0_21, %c0_22], %46 {strides = array<i32>} : memref<8x128xf32, #tpu.memory_space<vmem>>, vector<8x128xf32>,
    %48 = vector.shape_cast %43 : vector<8x1xi1> to vector<8x1xi1>
    %49 = vector.broadcast %48 : vector<8x1xi1> to vector<8x128xi1>
    %50 = arith.select %49, %39, %12 : vector<8x128xi1>, vector<8x128xf32>
    %c0_23 = arith.constant 0 : index
    %c0_24 = arith.constant 0 : index
    %51 = vector.load %arg6[%c0_23, %c0_24] : memref<8x128xf32, #tpu.memory_space<vmem>>, vector<8x128xf32>
    tpu.vector_store %arg6[%c0_23, %c0_24], %50 {strides = array<i32>} : memref<8x128xf32, #tpu.memory_space<vmem>>, vector<8x128xf32>,
    %cst_25 = arith.constant 0.000000e+00 : f32
    %52 = vector.shape_cast %43 : vector<8x1xi1> to vector<8x1xi1>
    %53 = vector.broadcast %52 : vector<8x1xi1> to vector<8x128xi1>
    %54 = vector.broadcast %cst_25 : f32 to vector<8x128xf32>
    %55 = arith.select %53, %41, %54 : vector<8x128xi1>, vector<8x128xf32>
    %c0_26 = arith.constant 0 : index
    %56 = arith.index_cast %7 : i32 to index
    %c0_27 = arith.constant 0 : index
    %c0_28 = arith.constant 0 : index
    %57 = vector.load %arg4[%c0_26, %56, %c0_27, %c0_28] : memref<1x8x8x128xf32, #tpu.memory_space<vmem>>, vector<1x1x8x128xf32>
    %58 = vector.shape_cast %57 : vector<1x1x8x128xf32> to vector<8x128xf32>
    %59 = vector.shape_cast %55 : vector<8x128xf32> to vector<1x1x8x128xf32>
    tpu.vector_store %arg4[%c0_26, %56, %c0_27, %c0_28], %59 {strides = array<i32>} : memref<1x8x8x128xf32, #tpu.memory_space<vmem>>, vector<1x1x8x128xf32>,
    %c1_i32 = arith.constant 1 : i32
    %c7_i32_29 = arith.constant 7 : i32
    %60 = arith.subi %c7_i32_29, %c1_i32 : i32
    %61 = arith.select %0, %60, %c1_i32 : i32
    %c0_30 = arith.constant 0 : index
    %62 = arith.index_cast %61 : i32 to index
    %c0_31 = arith.constant 0 : index
    %c0_32 = arith.constant 0 : index
    %63 = vector.load %arg2[%c0_30, %62, %c0_31, %c0_32] : memref<1x8x8x512xf32, #tpu.memory_space<vmem>>, vector<1x1x8x512xf32>
    %64 = vector.shape_cast %63 : vector<1x1x8x512xf32> to vector<8x512xf32>
    %c0_33 = arith.constant 0 : index
    %c0_34 = arith.constant 0 : index
    %65 = vector.load %arg5[%c0_33, %c0_34] : memref<8x128xf32, #tpu.memory_space<vmem>>, vector<8x128xf32>
    %c0_35 = arith.constant 0 : index
    %c0_36 = arith.constant 0 : index
    %66 = vector.load %arg6[%c0_35, %c0_36] : memref<8x128xf32, #tpu.memory_space<vmem>>, vector<8x128xf32>
    %c0_37 = arith.constant 0 : index
    %c0_38 = arith.constant 0 : index
    %c0_39 = arith.constant 0 : index
    %67 = vector.load %arg3[%c0_37, %c0_38, %c0_39] : memref<1x128x512xf32, #tpu.memory_space<vmem>>, vector<1x128x512xf32>
    %68 = vector.shape_cast %67 : vector<1x128x512xf32> to vector<128x512xf32>
    %cst_40 = arith.constant dense<0.000000e+00> : vector<8x512xf32>
    %69 = tpu.matmul %65, %68, %cst_40 {dimension_numbers = #tpu.dot_dimension_numbers<[1], [0], [0], [1], [0, 0, 1, 1], [], []>} : vector<8x128xf32>, vector<128x512xf32>, vector<8x512xf32> -> vector<8x512xf32>
    %70 = arith.addf %64, %69 : vector<8x512xf32>
    %71 = vector.extract_strided_slice %70 {offsets = [0, 0], sizes = [8, 128], strides = [1, 1]} : vector<8x512xf32> to vector<8x128xf32>
    %72 = arith.negf %71 : vector<8x128xf32>
    %73 = math.exp %72 : vector<8x128xf32>
    %cst_41 = arith.constant 1.000000e+00 : f32
    %74 = vector.broadcast %cst_41 : f32 to vector<8x128xf32>
    %75 = arith.addf %74, %73 : vector<8x128xf32>
    %76 = arith.divf %74, %75 : vector<8x128xf32>
    %77 = vector.extract_strided_slice %70 {offsets = [0, 128], sizes = [8, 128], strides = [1, 1]} : vector<8x512xf32> to vector<8x128xf32>
    %78 = arith.negf %77 : vector<8x128xf32>
    %79 = math.exp %78 : vector<8x128xf32>
    %cst_42 = arith.constant 1.000000e+00 : f32
    %80 = vector.broadcast %cst_42 : f32 to vector<8x128xf32>
    %81 = arith.addf %80, %79 : vector<8x128xf32>
    %82 = arith.divf %80, %81 : vector<8x128xf32>
    %83 = vector.extract_strided_slice %70 {offsets = [0, 256], sizes = [8, 128], strides = [1, 1]} : vector<8x512xf32> to vector<8x128xf32>
    %84 = math.tanh %83 : vector<8x128xf32>
    %85 = vector.extract_strided_slice %70 {offsets = [0, 384], sizes = [8, 128], strides = [1, 1]} : vector<8x512xf32> to vector<8x128xf32>
    %86 = arith.negf %85 : vector<8x128xf32>
    %87 = math.exp %86 : vector<8x128xf32>
    %cst_43 = arith.constant 1.000000e+00 : f32
    %88 = vector.broadcast %cst_43 : f32 to vector<8x128xf32>
    %89 = arith.addf %88, %87 : vector<8x128xf32>
    %90 = arith.divf %88, %89 : vector<8x128xf32>
    %91 = arith.mulf %82, %66 : vector<8x128xf32>
    %92 = arith.mulf %76, %84 : vector<8x128xf32>
    %93 = arith.addf %91, %92 : vector<8x128xf32>
    %94 = math.tanh %93 : vector<8x128xf32>
    %95 = arith.mulf %90, %94 : vector<8x128xf32>
    %96 = vector.broadcast %61 : i32 to vector<8x1xi32>
    %97 = arith.cmpi slt, %96, %1 : vector<8x1xi32>
    %98 = vector.shape_cast %97 : vector<8x1xi1> to vector<8x1xi1>
    %99 = vector.broadcast %98 : vector<8x1xi1> to vector<8x128xi1>
    %100 = arith.select %99, %95, %65 : vector<8x128xi1>, vector<8x128xf32>
    %c0_44 = arith.constant 0 : index
    %c0_45 = arith.constant 0 : index
    %101 = vector.load %arg5[%c0_44, %c0_45] : memref<8x128xf32, #tpu.memory_space<vmem>>, vector<8x128xf32>
    tpu.vector_store %arg5[%c0_44, %c0_45], %100 {strides = array<i32>} : memref<8x128xf32, #tpu.memory_space<vmem>>, vector<8x128xf32>,
    %102 = vector.shape_cast %97 : vector<8x1xi1> to vector<8x1xi1>
    %103 = vector.broadcast %102 : vector<8x1xi1> to vector<8x128xi1>
    %104 = arith.select %103, %93, %66 : vector<8x128xi1>, vector<8x128xf32>
    %c0_46 = arith.constant 0 : index
    %c0_47 = arith.constant 0 : index
    %105 = vector.load %arg6[%c0_46, %c0_47] : memref<8x128xf32, #tpu.memory_space<vmem>>, vector<8x128xf32>
    tpu.vector_store %arg6[%c0_46, %c0_47], %104 {strides = array<i32>} : memref<8x128xf32, #tpu.memory_space<vmem>>, vector<8x128xf32>,
    %cst_48 = arith.constant 0.000000e+00 : f32
    %106 = vector.shape_cast %97 : vector<8x1xi1> to vector<8x1xi1>
    %107 = vector.broadcast %106 : vector<8x1xi1> to vector<8x128xi1>
    %108 = vector.broadcast %cst_48 : f32 to vector<8x128xf32>
    %109 = arith.select %107, %95, %108 : vector<8x128xi1>, vector<8x128xf32>
    %c0_49 = arith.constant 0 : index
    %110 = arith.index_cast %61 : i32 to index
    %c0_50 = arith.constant 0 : index
    %c0_51 = arith.constant 0 : index
    %111 = vector.load %arg4[%c0_49, %110, %c0_50, %c0_51] : memref<1x8x8x128xf32, #tpu.memory_space<vmem>>, vector<1x1x8x128xf32>
    %112 = vector.shape_cast %111 : vector<1x1x8x128xf32> to vector<8x128xf32>
    %113 = vector.shape_cast %109 : vector<8x128xf32> to vector<1x1x8x128xf32>
    tpu.vector_store %arg4[%c0_49, %110, %c0_50, %c0_51], %113 {strides = array<i32>} : memref<1x8x8x128xf32, #tpu.memory_space<vmem>>, vector<1x1x8x128xf32>,
    %c2_i32 = arith.constant 2 : i32
    %c7_i32_52 = arith.constant 7 : i32
    %114 = arith.subi %c7_i32_52, %c2_i32 : i32
    %115 = arith.select %0, %114, %c2_i32 : i32
    %c0_53 = arith.constant 0 : index
    %116 = arith.index_cast %115 : i32 to index
    %c0_54 = arith.constant 0 : index
    %c0_55 = arith.constant 0 : index
    %117 = vector.load %arg2[%c0_53, %116, %c0_54, %c0_55] : memref<1x8x8x512xf32, #tpu.memory_space<vmem>>, vector<1x1x8x512xf32>
    %118 = vector.shape_cast %117 : vector<1x1x8x512xf32> to vector<8x512xf32>
    %c0_56 = arith.constant 0 : index
    %c0_57 = arith.constant 0 : index
    %119 = vector.load %arg5[%c0_56, %c0_57] : memref<8x128xf32, #tpu.memory_space<vmem>>, vector<8x128xf32>
    %c0_58 = arith.constant 0 : index
    %c0_59 = arith.constant 0 : index
    %120 = vector.load %arg6[%c0_58, %c0_59] : memref<8x128xf32, #tpu.memory_space<vmem>>, vector<8x128xf32>
    %c0_60 = arith.constant 0 : index
    %c0_61 = arith.constant 0 : index
    %c0_62 = arith.constant 0 : index
    %121 = vector.load %arg3[%c0_60, %c0_61, %c0_62] : memref<1x128x512xf32, #tpu.memory_space<vmem>>, vector<1x128x512xf32>
    %122 = vector.shape_cast %121 : vector<1x128x512xf32> to vector<128x512xf32>
    %cst_63 = arith.constant dense<0.000000e+00> : vector<8x512xf32>
    %123 = tpu.matmul %119, %122, %cst_63 {dimension_numbers = #tpu.dot_dimension_numbers<[1], [0], [0], [1], [0, 0, 1, 1], [], []>} : vector<8x128xf32>, vector<128x512xf32>, vector<8x512xf32> -> vector<8x512xf32>
    %124 = arith.addf %118, %123 : vector<8x512xf32>
    %125 = vector.extract_strided_slice %124 {offsets = [0, 0], sizes = [8, 128], strides = [1, 1]} : vector<8x512xf32> to vector<8x128xf32>
    %126 = arith.negf %125 : vector<8x128xf32>
    %127 = math.exp %126 : vector<8x128xf32>
    %cst_64 = arith.constant 1.000000e+00 : f32
    %128 = vector.broadcast %cst_64 : f32 to vector<8x128xf32>
    %129 = arith.addf %128, %127 : vector<8x128xf32>
    %130 = arith.divf %128, %129 : vector<8x128xf32>
    %131 = vector.extract_strided_slice %124 {offsets = [0, 128], sizes = [8, 128], strides = [1, 1]} : vector<8x512xf32> to vector<8x128xf32>
    %132 = arith.negf %131 : vector<8x128xf32>
    %133 = math.exp %132 : vector<8x128xf32>
    %cst_65 = arith.constant 1.000000e+00 : f32
    %134 = vector.broadcast %cst_65 : f32 to vector<8x128xf32>
    %135 = arith.addf %134, %133 : vector<8x128xf32>
    %136 = arith.divf %134, %135 : vector<8x128xf32>
    %137 = vector.extract_strided_slice %124 {offsets = [0, 256], sizes = [8, 128], strides = [1, 1]} : vector<8x512xf32> to vector<8x128xf32>
    %138 = math.tanh %137 : vector<8x128xf32>
    %139 = vector.extract_strided_slice %124 {offsets = [0, 384], sizes = [8, 128], strides = [1, 1]} : vector<8x512xf32> to vector<8x128xf32>
    %140 = arith.negf %139 : vector<8x128xf32>
    %141 = math.exp %140 : vector<8x128xf32>
    %cst_66 = arith.constant 1.000000e+00 : f32
    %142 = vector.broadcast %cst_66 : f32 to vector<8x128xf32>
    %143 = arith.addf %142, %141 : vector<8x128xf32>
    %144 = arith.divf %142, %143 : vector<8x128xf32>
    %145 = arith.mulf %136, %120 : vector<8x128xf32>
    %146 = arith.mulf %130, %138 : vector<8x128xf32>
    %147 = arith.addf %145, %146 : vector<8x128xf32>
    %148 = math.tanh %147 : vector<8x128xf32>
    %149 = arith.mulf %144, %148 : vector<8x128xf32>
    %150 = vector.broadcast %115 : i32 to vector<8x1xi32>
    %151 = arith.cmpi slt, %150, %1 : vector<8x1xi32>
    %152 = vector.shape_cast %151 : vector<8x1xi1> to vector<8x1xi1>
    %153 = vector.broadcast %152 : vector<8x1xi1> to vector<8x128xi1>
    %154 = arith.select %153, %149, %119 : vector<8x128xi1>, vector<8x128xf32>
    %c0_67 = arith.constant 0 : index
    %c0_68 = arith.constant 0 : index
    %155 = vector.load %arg5[%c0_67, %c0_68] : memref<8x128xf32, #tpu.memory_space<vmem>>, vector<8x128xf32>
    tpu.vector_store %arg5[%c0_67, %c0_68], %154 {strides = array<i32>} : memref<8x128xf32, #tpu.memory_space<vmem>>, vector<8x128xf32>,
    %156 = vector.shape_cast %151 : vector<8x1xi1> to vector<8x1xi1>
    %157 = vector.broadcast %156 : vector<8x1xi1> to vector<8x128xi1>
    %158 = arith.select %157, %147, %120 : vector<8x128xi1>, vector<8x128xf32>
    %c0_69 = arith.constant 0 : index
    %c0_70 = arith.constant 0 : index
    %159 = vector.load %arg6[%c0_69, %c0_70] : memref<8x128xf32, #tpu.memory_space<vmem>>, vector<8x128xf32>
    tpu.vector_store %arg6[%c0_69, %c0_70], %158 {strides = array<i32>} : memref<8x128xf32, #tpu.memory_space<vmem>>, vector<8x128xf32>,
    %cst_71 = arith.constant 0.000000e+00 : f32
    %160 = vector.shape_cast %151 : vector<8x1xi1> to vector<8x1xi1>
    %161 = vector.broadcast %160 : vector<8x1xi1> to vector<8x128xi1>
    %162 = vector.broadcast %cst_71 : f32 to vector<8x128xf32>
    %163 = arith.select %161, %149, %162 : vector<8x128xi1>, vector<8x128xf32>
    %c0_72 = arith.constant 0 : index
    %164 = arith.index_cast %115 : i32 to index
    %c0_73 = arith.constant 0 : index
    %c0_74 = arith.constant 0 : index
    %165 = vector.load %arg4[%c0_72, %164, %c0_73, %c0_74] : memref<1x8x8x128xf32, #tpu.memory_space<vmem>>, vector<1x1x8x128xf32>
    %166 = vector.shape_cast %165 : vector<1x1x8x128xf32> to vector<8x128xf32>
    %167 = vector.shape_cast %163 : vector<8x128xf32> to vector<1x1x8x128xf32>
    tpu.vector_store %arg4[%c0_72, %164, %c0_73, %c0_74], %167 {strides = array<i32>} : memref<1x8x8x128xf32, #tpu.memory_space<vmem>>, vector<1x1x8x128xf32>,
    %c3_i32 = arith.constant 3 : i32
    %c7_i32_75 = arith.constant 7 : i32
    %168 = arith.subi %c7_i32_75, %c3_i32 : i32
    %169 = arith.select %0, %168, %c3_i32 : i32
    %c0_76 = arith.constant 0 : index
    %170 = arith.index_cast %169 : i32 to index
    %c0_77 = arith.constant 0 : index
    %c0_78 = arith.constant 0 : index
    %171 = vector.load %arg2[%c0_76, %170, %c0_77, %c0_78] : memref<1x8x8x512xf32, #tpu.memory_space<vmem>>, vector<1x1x8x512xf32>
    %172 = vector.shape_cast %171 : vector<1x1x8x512xf32> to vector<8x512xf32>
    %c0_79 = arith.constant 0 : index
    %c0_80 = arith.constant 0 : index
    %173 = vector.load %arg5[%c0_79, %c0_80] : memref<8x128xf32, #tpu.memory_space<vmem>>, vector<8x128xf32>
    %c0_81 = arith.constant 0 : index
    %c0_82 = arith.constant 0 : index
    %174 = vector.load %arg6[%c0_81, %c0_82] : memref<8x128xf32, #tpu.memory_space<vmem>>, vector<8x128xf32>
    %c0_83 = arith.constant 0 : index
    %c0_84 = arith.constant 0 : index
    %c0_85 = arith.constant 0 : index
    %175 = vector.load %arg3[%c0_83, %c0_84, %c0_85] : memref<1x128x512xf32, #tpu.memory_space<vmem>>, vector<1x128x512xf32>
    %176 = vector.shape_cast %175 : vector<1x128x512xf32> to vector<128x512xf32>
    %cst_86 = arith.constant dense<0.000000e+00> : vector<8x512xf32>
    %177 = tpu.matmul %173, %176, %cst_86 {dimension_numbers = #tpu.dot_dimension_numbers<[1], [0], [0], [1], [0, 0, 1, 1], [], []>} : vector<8x128xf32>, vector<128x512xf32>, vector<8x512xf32> -> vector<8x512xf32>
    %178 = arith.addf %172, %177 : vector<8x512xf32>
    %179 = vector.extract_strided_slice %178 {offsets = [0, 0], sizes = [8, 128], strides = [1, 1]} : vector<8x512xf32> to vector<8x128xf32>
    %180 = arith.negf %179 : vector<8x128xf32>
    %181 = math.exp %180 : vector<8x128xf32>
    %cst_87 = arith.constant 1.000000e+00 : f32
    %182 = vector.broadcast %cst_87 : f32 to vector<8x128xf32>
    %183 = arith.addf %182, %181 : vector<8x128xf32>
    %184 = arith.divf %182, %183 : vector<8x128xf32>
    %185 = vector.extract_strided_slice %178 {offsets = [0, 128], sizes = [8, 128], strides = [1, 1]} : vector<8x512xf32> to vector<8x128xf32>
    %186 = arith.negf %185 : vector<8x128xf32>
    %187 = math.exp %186 : vector<8x128xf32>
    %cst_88 = arith.constant 1.000000e+00 : f32
    %188 = vector.broadcast %cst_88 : f32 to vector<8x128xf32>
    %189 = arith.addf %188, %187 : vector<8x128xf32>
    %190 = arith.divf %188, %189 : vector<8x128xf32>
    %191 = vector.extract_strided_slice %178 {offsets = [0, 256], sizes = [8, 128], strides = [1, 1]} : vector<8x512xf32> to vector<8x128xf32>
    %192 = math.tanh %191 : vector<8x128xf32>
    %193 = vector.extract_strided_slice %178 {offsets = [0, 384], sizes = [8, 128], strides = [1, 1]} : vector<8x512xf32> to vector<8x128xf32>
    %194 = arith.negf %193 : vector<8x128xf32>
    %195 = math.exp %194 : vector<8x128xf32>
    %cst_89 = arith.constant 1.000000e+00 : f32
    %196 = vector.broadcast %cst_89 : f32 to vector<8x128xf32>
    %197 = arith.addf %196, %195 : vector<8x128xf32>
    %198 = arith.divf %196, %197 : vector<8x128xf32>
    %199 = arith.mulf %190, %174 : vector<8x128xf32>
    %200 = arith.mulf %184, %192 : vector<8x128xf32>
    %201 = arith.addf %199, %200 : vector<8x128xf32>
    %202 = math.tanh %201 : vector<8x128xf32>
    %203 = arith.mulf %198, %202 : vector<8x128xf32>
    %204 = vector.broadcast %169 : i32 to vector<8x1xi32>
    %205 = arith.cmpi slt, %204, %1 : vector<8x1xi32>
    %206 = vector.shape_cast %205 : vector<8x1xi1> to vector<8x1xi1>
    %207 = vector.broadcast %206 : vector<8x1xi1> to vector<8x128xi1>
    %208 = arith.select %207, %203, %173 : vector<8x128xi1>, vector<8x128xf32>
    %c0_90 = arith.constant 0 : index
    %c0_91 = arith.constant 0 : index
    %209 = vector.load %arg5[%c0_90, %c0_91] : memref<8x128xf32, #tpu.memory_space<vmem>>, vector<8x128xf32>
    tpu.vector_store %arg5[%c0_90, %c0_91], %208 {strides = array<i32>} : memref<8x128xf32, #tpu.memory_space<vmem>>, vector<8x128xf32>,
    %210 = vector.shape_cast %205 : vector<8x1xi1> to vector<8x1xi1>
    %211 = vector.broadcast %210 : vector<8x1xi1> to vector<8x128xi1>
    %212 = arith.select %211, %201, %174 : vector<8x128xi1>, vector<8x128xf32>
    %c0_92 = arith.constant 0 : index
    %c0_93 = arith.constant 0 : index
    %213 = vector.load %arg6[%c0_92, %c0_93] : memref<8x128xf32, #tpu.memory_space<vmem>>, vector<8x128xf32>
    tpu.vector_store %arg6[%c0_92, %c0_93], %212 {strides = array<i32>} : memref<8x128xf32, #tpu.memory_space<vmem>>, vector<8x128xf32>,
    %cst_94 = arith.constant 0.000000e+00 : f32
    %214 = vector.shape_cast %205 : vector<8x1xi1> to vector<8x1xi1>
    %215 = vector.broadcast %214 : vector<8x1xi1> to vector<8x128xi1>
    %216 = vector.broadcast %cst_94 : f32 to vector<8x128xf32>
    %217 = arith.select %215, %203, %216 : vector<8x128xi1>, vector<8x128xf32>
    %c0_95 = arith.constant 0 : index
    %218 = arith.index_cast %169 : i32 to index
    %c0_96 = arith.constant 0 : index
    %c0_97 = arith.constant 0 : index
    %219 = vector.load %arg4[%c0_95, %218, %c0_96, %c0_97] : memref<1x8x8x128xf32, #tpu.memory_space<vmem>>, vector<1x1x8x128xf32>
    %220 = vector.shape_cast %219 : vector<1x1x8x128xf32> to vector<8x128xf32>
    %221 = vector.shape_cast %217 : vector<8x128xf32> to vector<1x1x8x128xf32>
    tpu.vector_store %arg4[%c0_95, %218, %c0_96, %c0_97], %221 {strides = array<i32>} : memref<1x8x8x128xf32, #tpu.memory_space<vmem>>, vector<1x1x8x128xf32>,
    %c4_i32 = arith.constant 4 : i32
    %c7_i32_98 = arith.constant 7 : i32
    %222 = arith.subi %c7_i32_98, %c4_i32 : i32
    %223 = arith.select %0, %222, %c4_i32 : i32
    %c0_99 = arith.constant 0 : index
    %224 = arith.index_cast %223 : i32 to index
    %c0_100 = arith.constant 0 : index
    %c0_101 = arith.constant 0 : index
    %225 = vector.load %arg2[%c0_99, %224, %c0_100, %c0_101] : memref<1x8x8x512xf32, #tpu.memory_space<vmem>>, vector<1x1x8x512xf32>
    %226 = vector.shape_cast %225 : vector<1x1x8x512xf32> to vector<8x512xf32>
    %c0_102 = arith.constant 0 : index
    %c0_103 = arith.constant 0 : index
    %227 = vector.load %arg5[%c0_102, %c0_103] : memref<8x128xf32, #tpu.memory_space<vmem>>, vector<8x128xf32>
    %c0_104 = arith.constant 0 : index
    %c0_105 = arith.constant 0 : index
    %228 = vector.load %arg6[%c0_104, %c0_105] : memref<8x128xf32, #tpu.memory_space<vmem>>, vector<8x128xf32>
    %c0_106 = arith.constant 0 : index
    %c0_107 = arith.constant 0 : index
    %c0_108 = arith.constant 0 : index
    %229 = vector.load %arg3[%c0_106, %c0_107, %c0_108] : memref<1x128x512xf32, #tpu.memory_space<vmem>>, vector<1x128x512xf32>
    %230 = vector.shape_cast %229 : vector<1x128x512xf32> to vector<128x512xf32>
    %cst_109 = arith.constant dense<0.000000e+00> : vector<8x512xf32>
    %231 = tpu.matmul %227, %230, %cst_109 {dimension_numbers = #tpu.dot_dimension_numbers<[1], [0], [0], [1], [0, 0, 1, 1], [], []>} : vector<8x128xf32>, vector<128x512xf32>, vector<8x512xf32> -> vector<8x512xf32>
    %232 = arith.addf %226, %231 : vector<8x512xf32>
    %233 = vector.extract_strided_slice %232 {offsets = [0, 0], sizes = [8, 128], strides = [1, 1]} : vector<8x512xf32> to vector<8x128xf32>
    %234 = arith.negf %233 : vector<8x128xf32>
    %235 = math.exp %234 : vector<8x128xf32>
    %cst_110 = arith.constant 1.000000e+00 : f32
    %236 = vector.broadcast %cst_110 : f32 to vector<8x128xf32>
    %237 = arith.addf %236, %235 : vector<8x128xf32>
    %238 = arith.divf %236, %237 : vector<8x128xf32>
    %239 = vector.extract_strided_slice %232 {offsets = [0, 128], sizes = [8, 128], strides = [1, 1]} : vector<8x512xf32> to vector<8x128xf32>
    %240 = arith.negf %239 : vector<8x128xf32>
    %241 = math.exp %240 : vector<8x128xf32>
    %cst_111 = arith.constant 1.000000e+00 : f32
    %242 = vector.broadcast %cst_111 : f32 to vector<8x128xf32>
    %243 = arith.addf %242, %241 : vector<8x128xf32>
    %244 = arith.divf %242, %243 : vector<8x128xf32>
    %245 = vector.extract_strided_slice %232 {offsets = [0, 256], sizes = [8, 128], strides = [1, 1]} : vector<8x512xf32> to vector<8x128xf32>
    %246 = math.tanh %245 : vector<8x128xf32>
    %247 = vector.extract_strided_slice %232 {offsets = [0, 384], sizes = [8, 128], strides = [1, 1]} : vector<8x512xf32> to vector<8x128xf32>
    %248 = arith.negf %247 : vector<8x128xf32>
    %249 = math.exp %248 : vector<8x128xf32>
    %cst_112 = arith.constant 1.000000e+00 : f32
    %250 = vector.broadcast %cst_112 : f32 to vector<8x128xf32>
    %251 = arith.addf %250, %249 : vector<8x128xf32>
    %252 = arith.divf %250, %251 : vector<8x128xf32>
    %253 = arith.mulf %244, %228 : vector<8x128xf32>
    %254 = arith.mulf %238, %246 : vector<8x128xf32>
    %255 = arith.addf %253, %254 : vector<8x128xf32>
    %256 = math.tanh %255 : vector<8x128xf32>
    %257 = arith.mulf %252, %256 : vector<8x128xf32>
    %258 = vector.broadcast %223 : i32 to vector<8x1xi32>
    %259 = arith.cmpi slt, %258, %1 : vector<8x1xi32>
    %260 = vector.shape_cast %259 : vector<8x1xi1> to vector<8x1xi1>
    %261 = vector.broadcast %260 : vector<8x1xi1> to vector<8x128xi1>
    %262 = arith.select %261, %257, %227 : vector<8x128xi1>, vector<8x128xf32>
    %c0_113 = arith.constant 0 : index
    %c0_114 = arith.constant 0 : index
    %263 = vector.load %arg5[%c0_113, %c0_114] : memref<8x128xf32, #tpu.memory_space<vmem>>, vector<8x128xf32>
    tpu.vector_store %arg5[%c0_113, %c0_114], %262 {strides = array<i32>} : memref<8x128xf32, #tpu.memory_space<vmem>>, vector<8x128xf32>,
    %264 = vector.shape_cast %259 : vector<8x1xi1> to vector<8x1xi1>
    %265 = vector.broadcast %264 : vector<8x1xi1> to vector<8x128xi1>
    %266 = arith.select %265, %255, %228 : vector<8x128xi1>, vector<8x128xf32>
    %c0_115 = arith.constant 0 : index
    %c0_116 = arith.constant 0 : index
    %267 = vector.load %arg6[%c0_115, %c0_116] : memref<8x128xf32, #tpu.memory_space<vmem>>, vector<8x128xf32>
    tpu.vector_store %arg6[%c0_115, %c0_116], %266 {strides = array<i32>} : memref<8x128xf32, #tpu.memory_space<vmem>>, vector<8x128xf32>,
    %cst_117 = arith.constant 0.000000e+00 : f32
    %268 = vector.shape_cast %259 : vector<8x1xi1> to vector<8x1xi1>
    %269 = vector.broadcast %268 : vector<8x1xi1> to vector<8x128xi1>
    %270 = vector.broadcast %cst_117 : f32 to vector<8x128xf32>
    %271 = arith.select %269, %257, %270 : vector<8x128xi1>, vector<8x128xf32>
    %c0_118 = arith.constant 0 : index
    %272 = arith.index_cast %223 : i32 to index
    %c0_119 = arith.constant 0 : index
    %c0_120 = arith.constant 0 : index
    %273 = vector.load %arg4[%c0_118, %272, %c0_119, %c0_120] : memref<1x8x8x128xf32, #tpu.memory_space<vmem>>, vector<1x1x8x128xf32>
    %274 = vector.shape_cast %273 : vector<1x1x8x128xf32> to vector<8x128xf32>
    %275 = vector.shape_cast %271 : vector<8x128xf32> to vector<1x1x8x128xf32>
    tpu.vector_store %arg4[%c0_118, %272, %c0_119, %c0_120], %275 {strides = array<i32>} : memref<1x8x8x128xf32, #tpu.memory_space<vmem>>, vector<1x1x8x128xf32>,
    %c5_i32 = arith.constant 5 : i32
    %c7_i32_121 = arith.constant 7 : i32
    %276 = arith.subi %c7_i32_121, %c5_i32 : i32
    %277 = arith.select %0, %276, %c5_i32 : i32
    %c0_122 = arith.constant 0 : index
    %278 = arith.index_cast %277 : i32 to index
    %c0_123 = arith.constant 0 : index
    %c0_124 = arith.constant 0 : index
    %279 = vector.load %arg2[%c0_122, %278, %c0_123, %c0_124] : memref<1x8x8x512xf32, #tpu.memory_space<vmem>>, vector<1x1x8x512xf32>
    %280 = vector.shape_cast %279 : vector<1x1x8x512xf32> to vector<8x512xf32>
    %c0_125 = arith.constant 0 : index
    %c0_126 = arith.constant 0 : index
    %281 = vector.load %arg5[%c0_125, %c0_126] : memref<8x128xf32, #tpu.memory_space<vmem>>, vector<8x128xf32>
    %c0_127 = arith.constant 0 : index
    %c0_128 = arith.constant 0 : index
    %282 = vector.load %arg6[%c0_127, %c0_128] : memref<8x128xf32, #tpu.memory_space<vmem>>, vector<8x128xf32>
    %c0_129 = arith.constant 0 : index
    %c0_130 = arith.constant 0 : index
    %c0_131 = arith.constant 0 : index
    %283 = vector.load %arg3[%c0_129, %c0_130, %c0_131] : memref<1x128x512xf32, #tpu.memory_space<vmem>>, vector<1x128x512xf32>
    %284 = vector.shape_cast %283 : vector<1x128x512xf32> to vector<128x512xf32>
    %cst_132 = arith.constant dense<0.000000e+00> : vector<8x512xf32>
    %285 = tpu.matmul %281, %284, %cst_132 {dimension_numbers = #tpu.dot_dimension_numbers<[1], [0], [0], [1], [0, 0, 1, 1], [], []>} : vector<8x128xf32>, vector<128x512xf32>, vector<8x512xf32> -> vector<8x512xf32>
    %286 = arith.addf %280, %285 : vector<8x512xf32>
    %287 = vector.extract_strided_slice %286 {offsets = [0, 0], sizes = [8, 128], strides = [1, 1]} : vector<8x512xf32> to vector<8x128xf32>
    %288 = arith.negf %287 : vector<8x128xf32>
    %289 = math.exp %288 : vector<8x128xf32>
    %cst_133 = arith.constant 1.000000e+00 : f32
    %290 = vector.broadcast %cst_133 : f32 to vector<8x128xf32>
    %291 = arith.addf %290, %289 : vector<8x128xf32>
    %292 = arith.divf %290, %291 : vector<8x128xf32>
    %293 = vector.extract_strided_slice %286 {offsets = [0, 128], sizes = [8, 128], strides = [1, 1]} : vector<8x512xf32> to vector<8x128xf32>
    %294 = arith.negf %293 : vector<8x128xf32>
    %295 = math.exp %294 : vector<8x128xf32>
    %cst_134 = arith.constant 1.000000e+00 : f32
    %296 = vector.broadcast %cst_134 : f32 to vector<8x128xf32>
    %297 = arith.addf %296, %295 : vector<8x128xf32>
    %298 = arith.divf %296, %297 : vector<8x128xf32>
    %299 = vector.extract_strided_slice %286 {offsets = [0, 256], sizes = [8, 128], strides = [1, 1]} : vector<8x512xf32> to vector<8x128xf32>
    %300 = math.tanh %299 : vector<8x128xf32>
    %301 = vector.extract_strided_slice %286 {offsets = [0, 384], sizes = [8, 128], strides = [1, 1]} : vector<8x512xf32> to vector<8x128xf32>
    %302 = arith.negf %301 : vector<8x128xf32>
    %303 = math.exp %302 : vector<8x128xf32>
    %cst_135 = arith.constant 1.000000e+00 : f32
    %304 = vector.broadcast %cst_135 : f32 to vector<8x128xf32>
    %305 = arith.addf %304, %303 : vector<8x128xf32>
    %306 = arith.divf %304, %305 : vector<8x128xf32>
    %307 = arith.mulf %298, %282 : vector<8x128xf32>
    %308 = arith.mulf %292, %300 : vector<8x128xf32>
    %309 = arith.addf %307, %308 : vector<8x128xf32>
    %310 = math.tanh %309 : vector<8x128xf32>
    %311 = arith.mulf %306, %310 : vector<8x128xf32>
    %312 = vector.broadcast %277 : i32 to vector<8x1xi32>
    %313 = arith.cmpi slt, %312, %1 : vector<8x1xi32>
    %314 = vector.shape_cast %313 : vector<8x1xi1> to vector<8x1xi1>
    %315 = vector.broadcast %314 : vector<8x1xi1> to vector<8x128xi1>
    %316 = arith.select %315, %311, %281 : vector<8x128xi1>, vector<8x128xf32>
    %c0_136 = arith.constant 0 : index
    %c0_137 = arith.constant 0 : index
    %317 = vector.load %arg5[%c0_136, %c0_137] : memref<8x128xf32, #tpu.memory_space<vmem>>, vector<8x128xf32>
    tpu.vector_store %arg5[%c0_136, %c0_137], %316 {strides = array<i32>} : memref<8x128xf32, #tpu.memory_space<vmem>>, vector<8x128xf32>,
    %318 = vector.shape_cast %313 : vector<8x1xi1> to vector<8x1xi1>
    %319 = vector.broadcast %318 : vector<8x1xi1> to vector<8x128xi1>
    %320 = arith.select %319, %309, %282 : vector<8x128xi1>, vector<8x128xf32>
    %c0_138 = arith.constant 0 : index
    %c0_139 = arith.constant 0 : index
    %321 = vector.load %arg6[%c0_138, %c0_139] : memref<8x128xf32, #tpu.memory_space<vmem>>, vector<8x128xf32>
    tpu.vector_store %arg6[%c0_138, %c0_139], %320 {strides = array<i32>} : memref<8x128xf32, #tpu.memory_space<vmem>>, vector<8x128xf32>,
    %cst_140 = arith.constant 0.000000e+00 : f32
    %322 = vector.shape_cast %313 : vector<8x1xi1> to vector<8x1xi1>
    %323 = vector.broadcast %322 : vector<8x1xi1> to vector<8x128xi1>
    %324 = vector.broadcast %cst_140 : f32 to vector<8x128xf32>
    %325 = arith.select %323, %311, %324 : vector<8x128xi1>, vector<8x128xf32>
    %c0_141 = arith.constant 0 : index
    %326 = arith.index_cast %277 : i32 to index
    %c0_142 = arith.constant 0 : index
    %c0_143 = arith.constant 0 : index
    %327 = vector.load %arg4[%c0_141, %326, %c0_142, %c0_143] : memref<1x8x8x128xf32, #tpu.memory_space<vmem>>, vector<1x1x8x128xf32>
    %328 = vector.shape_cast %327 : vector<1x1x8x128xf32> to vector<8x128xf32>
    %329 = vector.shape_cast %325 : vector<8x128xf32> to vector<1x1x8x128xf32>
    tpu.vector_store %arg4[%c0_141, %326, %c0_142, %c0_143], %329 {strides = array<i32>} : memref<1x8x8x128xf32, #tpu.memory_space<vmem>>, vector<1x1x8x128xf32>,
    %c6_i32 = arith.constant 6 : i32
    %c7_i32_144 = arith.constant 7 : i32
    %330 = arith.subi %c7_i32_144, %c6_i32 : i32
    %331 = arith.select %0, %330, %c6_i32 : i32
    %c0_145 = arith.constant 0 : index
    %332 = arith.index_cast %331 : i32 to index
    %c0_146 = arith.constant 0 : index
    %c0_147 = arith.constant 0 : index
    %333 = vector.load %arg2[%c0_145, %332, %c0_146, %c0_147] : memref<1x8x8x512xf32, #tpu.memory_space<vmem>>, vector<1x1x8x512xf32>
    %334 = vector.shape_cast %333 : vector<1x1x8x512xf32> to vector<8x512xf32>
    %c0_148 = arith.constant 0 : index
    %c0_149 = arith.constant 0 : index
    %335 = vector.load %arg5[%c0_148, %c0_149] : memref<8x128xf32, #tpu.memory_space<vmem>>, vector<8x128xf32>
    %c0_150 = arith.constant 0 : index
    %c0_151 = arith.constant 0 : index
    %336 = vector.load %arg6[%c0_150, %c0_151] : memref<8x128xf32, #tpu.memory_space<vmem>>, vector<8x128xf32>
    %c0_152 = arith.constant 0 : index
    %c0_153 = arith.constant 0 : index
    %c0_154 = arith.constant 0 : index
    %337 = vector.load %arg3[%c0_152, %c0_153, %c0_154] : memref<1x128x512xf32, #tpu.memory_space<vmem>>, vector<1x128x512xf32>
    %338 = vector.shape_cast %337 : vector<1x128x512xf32> to vector<128x512xf32>
    %cst_155 = arith.constant dense<0.000000e+00> : vector<8x512xf32>
    %339 = tpu.matmul %335, %338, %cst_155 {dimension_numbers = #tpu.dot_dimension_numbers<[1], [0], [0], [1], [0, 0, 1, 1], [], []>} : vector<8x128xf32>, vector<128x512xf32>, vector<8x512xf32> -> vector<8x512xf32>
    %340 = arith.addf %334, %339 : vector<8x512xf32>
    %341 = vector.extract_strided_slice %340 {offsets = [0, 0], sizes = [8, 128], strides = [1, 1]} : vector<8x512xf32> to vector<8x128xf32>
    %342 = arith.negf %341 : vector<8x128xf32>
    %343 = math.exp %342 : vector<8x128xf32>
    %cst_156 = arith.constant 1.000000e+00 : f32
    %344 = vector.broadcast %cst_156 : f32 to vector<8x128xf32>
    %345 = arith.addf %344, %343 : vector<8x128xf32>
    %346 = arith.divf %344, %345 : vector<8x128xf32>
    %347 = vector.extract_strided_slice %340 {offsets = [0, 128], sizes = [8, 128], strides = [1, 1]} : vector<8x512xf32> to vector<8x128xf32>
    %348 = arith.negf %347 : vector<8x128xf32>
    %349 = math.exp %348 : vector<8x128xf32>
    %cst_157 = arith.constant 1.000000e+00 : f32
    %350 = vector.broadcast %cst_157 : f32 to vector<8x128xf32>
    %351 = arith.addf %350, %349 : vector<8x128xf32>
    %352 = arith.divf %350, %351 : vector<8x128xf32>
    %353 = vector.extract_strided_slice %340 {offsets = [0, 256], sizes = [8, 128], strides = [1, 1]} : vector<8x512xf32> to vector<8x128xf32>
    %354 = math.tanh %353 : vector<8x128xf32>
    %355 = vector.extract_strided_slice %340 {offsets = [0, 384], sizes = [8, 128], strides = [1, 1]} : vector<8x512xf32> to vector<8x128xf32>
    %356 = arith.negf %355 : vector<8x128xf32>
    %357 = math.exp %356 : vector<8x128xf32>
    %cst_158 = arith.constant 1.000000e+00 : f32
    %358 = vector.broadcast %cst_158 : f32 to vector<8x128xf32>
    %359 = arith.addf %358, %357 : vector<8x128xf32>
    %360 = arith.divf %358, %359 : vector<8x128xf32>
    %361 = arith.mulf %352, %336 : vector<8x128xf32>
    %362 = arith.mulf %346, %354 : vector<8x128xf32>
    %363 = arith.addf %361, %362 : vector<8x128xf32>
    %364 = math.tanh %363 : vector<8x128xf32>
    %365 = arith.mulf %360, %364 : vector<8x128xf32>
    %366 = vector.broadcast %331 : i32 to vector<8x1xi32>
    %367 = arith.cmpi slt, %366, %1 : vector<8x1xi32>
    %368 = vector.shape_cast %367 : vector<8x1xi1> to vector<8x1xi1>
    %369 = vector.broadcast %368 : vector<8x1xi1> to vector<8x128xi1>
    %370 = arith.select %369, %365, %335 : vector<8x128xi1>, vector<8x128xf32>
    %c0_159 = arith.constant 0 : index
    %c0_160 = arith.constant 0 : index
    %371 = vector.load %arg5[%c0_159, %c0_160] : memref<8x128xf32, #tpu.memory_space<vmem>>, vector<8x128xf32>
    tpu.vector_store %arg5[%c0_159, %c0_160], %370 {strides = array<i32>} : memref<8x128xf32, #tpu.memory_space<vmem>>, vector<8x128xf32>,
    %372 = vector.shape_cast %367 : vector<8x1xi1> to vector<8x1xi1>
    %373 = vector.broadcast %372 : vector<8x1xi1> to vector<8x128xi1>
    %374 = arith.select %373, %363, %336 : vector<8x128xi1>, vector<8x128xf32>
    %c0_161 = arith.constant 0 : index
    %c0_162 = arith.constant 0 : index
    %375 = vector.load %arg6[%c0_161, %c0_162] : memref<8x128xf32, #tpu.memory_space<vmem>>, vector<8x128xf32>
    tpu.vector_store %arg6[%c0_161, %c0_162], %374 {strides = array<i32>} : memref<8x128xf32, #tpu.memory_space<vmem>>, vector<8x128xf32>,
    %cst_163 = arith.constant 0.000000e+00 : f32
    %376 = vector.shape_cast %367 : vector<8x1xi1> to vector<8x1xi1>
    %377 = vector.broadcast %376 : vector<8x1xi1> to vector<8x128xi1>
    %378 = vector.broadcast %cst_163 : f32 to vector<8x128xf32>
    %379 = arith.select %377, %365, %378 : vector<8x128xi1>, vector<8x128xf32>
    %c0_164 = arith.constant 0 : index
    %380 = arith.index_cast %331 : i32 to index
    %c0_165 = arith.constant 0 : index
    %c0_166 = arith.constant 0 : index
    %381 = vector.load %arg4[%c0_164, %380, %c0_165, %c0_166] : memref<1x8x8x128xf32, #tpu.memory_space<vmem>>, vector<1x1x8x128xf32>
    %382 = vector.shape_cast %381 : vector<1x1x8x128xf32> to vector<8x128xf32>
    %383 = vector.shape_cast %379 : vector<8x128xf32> to vector<1x1x8x128xf32>
    tpu.vector_store %arg4[%c0_164, %380, %c0_165, %c0_166], %383 {strides = array<i32>} : memref<1x8x8x128xf32, #tpu.memory_space<vmem>>, vector<1x1x8x128xf32>,
    %c7_i32_167 = arith.constant 7 : i32
    %c7_i32_168 = arith.constant 7 : i32
    %384 = arith.subi %c7_i32_168, %c7_i32_167 : i32
    %385 = arith.select %0, %384, %c7_i32_167 : i32
    %c0_169 = arith.constant 0 : index
    %386 = arith.index_cast %385 : i32 to index
    %c0_170 = arith.constant 0 : index
    %c0_171 = arith.constant 0 : index
    %387 = vector.load %arg2[%c0_169, %386, %c0_170, %c0_171] : memref<1x8x8x512xf32, #tpu.memory_space<vmem>>, vector<1x1x8x512xf32>
    %388 = vector.shape_cast %387 : vector<1x1x8x512xf32> to vector<8x512xf32>
    %c0_172 = arith.constant 0 : index
    %c0_173 = arith.constant 0 : index
    %389 = vector.load %arg5[%c0_172, %c0_173] : memref<8x128xf32, #tpu.memory_space<vmem>>, vector<8x128xf32>
    %c0_174 = arith.constant 0 : index
    %c0_175 = arith.constant 0 : index
    %390 = vector.load %arg6[%c0_174, %c0_175] : memref<8x128xf32, #tpu.memory_space<vmem>>, vector<8x128xf32>
    %c0_176 = arith.constant 0 : index
    %c0_177 = arith.constant 0 : index
    %c0_178 = arith.constant 0 : index
    %391 = vector.load %arg3[%c0_176, %c0_177, %c0_178] : memref<1x128x512xf32, #tpu.memory_space<vmem>>, vector<1x128x512xf32>
    %392 = vector.shape_cast %391 : vector<1x128x512xf32> to vector<128x512xf32>
    %cst_179 = arith.constant dense<0.000000e+00> : vector<8x512xf32>
    %393 = tpu.matmul %389, %392, %cst_179 {dimension_numbers = #tpu.dot_dimension_numbers<[1], [0], [0], [1], [0, 0, 1, 1], [], []>} : vector<8x128xf32>, vector<128x512xf32>, vector<8x512xf32> -> vector<8x512xf32>
    %394 = arith.addf %388, %393 : vector<8x512xf32>
    %395 = vector.extract_strided_slice %394 {offsets = [0, 0], sizes = [8, 128], strides = [1, 1]} : vector<8x512xf32> to vector<8x128xf32>
    %396 = arith.negf %395 : vector<8x128xf32>
    %397 = math.exp %396 : vector<8x128xf32>
    %cst_180 = arith.constant 1.000000e+00 : f32
    %398 = vector.broadcast %cst_180 : f32 to vector<8x128xf32>
    %399 = arith.addf %398, %397 : vector<8x128xf32>
    %400 = arith.divf %398, %399 : vector<8x128xf32>
    %401 = vector.extract_strided_slice %394 {offsets = [0, 128], sizes = [8, 128], strides = [1, 1]} : vector<8x512xf32> to vector<8x128xf32>
    %402 = arith.negf %401 : vector<8x128xf32>
    %403 = math.exp %402 : vector<8x128xf32>
    %cst_181 = arith.constant 1.000000e+00 : f32
    %404 = vector.broadcast %cst_181 : f32 to vector<8x128xf32>
    %405 = arith.addf %404, %403 : vector<8x128xf32>
    %406 = arith.divf %404, %405 : vector<8x128xf32>
    %407 = vector.extract_strided_slice %394 {offsets = [0, 256], sizes = [8, 128], strides = [1, 1]} : vector<8x512xf32> to vector<8x128xf32>
    %408 = math.tanh %407 : vector<8x128xf32>
    %409 = vector.extract_strided_slice %394 {offsets = [0, 384], sizes = [8, 128], strides = [1, 1]} : vector<8x512xf32> to vector<8x128xf32>
    %410 = arith.negf %409 : vector<8x128xf32>
    %411 = math.exp %410 : vector<8x128xf32>
    %cst_182 = arith.constant 1.000000e+00 : f32
    %412 = vector.broadcast %cst_182 : f32 to vector<8x128xf32>
    %413 = arith.addf %412, %411 : vector<8x128xf32>
    %414 = arith.divf %412, %413 : vector<8x128xf32>
    %415 = arith.mulf %406, %390 : vector<8x128xf32>
    %416 = arith.mulf %400, %408 : vector<8x128xf32>
    %417 = arith.addf %415, %416 : vector<8x128xf32>
    %418 = math.tanh %417 : vector<8x128xf32>
    %419 = arith.mulf %414, %418 : vector<8x128xf32>
    %420 = vector.broadcast %385 : i32 to vector<8x1xi32>
    %421 = arith.cmpi slt, %420, %1 : vector<8x1xi32>
    %422 = vector.shape_cast %421 : vector<8x1xi1> to vector<8x1xi1>
    %423 = vector.broadcast %422 : vector<8x1xi1> to vector<8x128xi1>
    %424 = arith.select %423, %419, %389 : vector<8x128xi1>, vector<8x128xf32>
    %c0_183 = arith.constant 0 : index
    %c0_184 = arith.constant 0 : index
    %425 = vector.load %arg5[%c0_183, %c0_184] : memref<8x128xf32, #tpu.memory_space<vmem>>, vector<8x128xf32>
    tpu.vector_store %arg5[%c0_183, %c0_184], %424 {strides = array<i32>} : memref<8x128xf32, #tpu.memory_space<vmem>>, vector<8x128xf32>,
    %426 = vector.shape_cast %421 : vector<8x1xi1> to vector<8x1xi1>
    %427 = vector.broadcast %426 : vector<8x1xi1> to vector<8x128xi1>
    %428 = arith.select %427, %417, %390 : vector<8x128xi1>, vector<8x128xf32>
    %c0_185 = arith.constant 0 : index
    %c0_186 = arith.constant 0 : index
    %429 = vector.load %arg6[%c0_185, %c0_186] : memref<8x128xf32, #tpu.memory_space<vmem>>, vector<8x128xf32>
    tpu.vector_store %arg6[%c0_185, %c0_186], %428 {strides = array<i32>} : memref<8x128xf32, #tpu.memory_space<vmem>>, vector<8x128xf32>,
    %cst_187 = arith.constant 0.000000e+00 : f32
    %430 = vector.shape_cast %421 : vector<8x1xi1> to vector<8x1xi1>
    %431 = vector.broadcast %430 : vector<8x1xi1> to vector<8x128xi1>
    %432 = vector.broadcast %cst_187 : f32 to vector<8x128xf32>
    %433 = arith.select %431, %419, %432 : vector<8x128xi1>, vector<8x128xf32>
    %c0_188 = arith.constant 0 : index
    %434 = arith.index_cast %385 : i32 to index
    %c0_189 = arith.constant 0 : index
    %c0_190 = arith.constant 0 : index
    %435 = vector.load %arg4[%c0_188, %434, %c0_189, %c0_190] : memref<1x8x8x128xf32, #tpu.memory_space<vmem>>, vector<1x1x8x128xf32>
    %436 = vector.shape_cast %435 : vector<1x1x8x128xf32> to vector<8x128xf32>
    %437 = vector.shape_cast %433 : vector<8x128xf32> to vector<1x1x8x128xf32>
    tpu.vector_store %arg4[%c0_188, %434, %c0_189, %c0_190], %437 {strides = array<i32>} : memref<1x8x8x128xf32, #tpu.memory_space<vmem>>, vector<1x1x8x128xf32>,
    %c8_i32 = arith.constant 8 : i32
    return
  }
  func.func @transform_0(%arg0: i32) -> (i32, i32) {
    %c0_i32 = arith.constant 0 : i32
    %c0_i32_0 = arith.constant 0 : i32
    %c0_i32_1 = arith.constant 0 : i32
    return %c0_i32, %c0_i32_0 : i32, i32
  }
  func.func @transform_1(%arg0: i32) -> (i32, i32, i32, i32) {
    %c0_i32 = arith.constant 0 : i32
    %c0_i32_0 = arith.constant 0 : i32
    %c0_i32_1 = arith.constant 0 : i32
    %c0_i32_2 = arith.constant 0 : i32
    return %arg0, %c0_i32, %c0_i32_0, %c0_i32_1 : i32, i32, i32, i32
  }
  func.func @transform_2(%arg0: i32) -> (i32, i32, i32) {
    %c0_i32 = arith.constant 0 : i32
    %c0_i32_0 = arith.constant 0 : i32
    %c0_i32_1 = arith.constant 0 : i32
    return %arg0, %c0_i32, %c0_i32_0 : i32, i32, i32
  }
  func.func @transform_3(%arg0: i32) -> (i32, i32, i32, i32) {
    %c0_i32 = arith.constant 0 : i32
    %c0_i32_0 = arith.constant 0 : i32
    %c0_i32_1 = arith.constant 0 : i32
    %c0_i32_2 = arith.constant 0 : i32
    return %arg0, %c0_i32, %c0_i32_0, %c0_i32_1 : i32, i32, i32, i32
  }
}

</mosaic_0001>

<bundles_post_ra>
// kernel: seq_classifier_forward.2
= control target key start
LH: loop header
LB: loop body
LE: loop exit
PB: predicated region body
PF: predicated region fallthrough
CT: control target
= control target key end

     0   :  { %s2610_s12 = smov 0   ;;  %s3786_s0 = inlined_call_operand.vmem [shape: s32[8,1], index: 0, kind: input, shape index: {}]   ;;  %s3787_s1 = inlined_call_operand.vmem [shape: f32[2,8,8,512], index: 1, kind: input, shape index: {}]   ;;  %s3788_s2 = inlined_call_operand.vmem [shape: f32[2,128,512], index: 2, kind: input, shape index: {}]   ;;  %s3789_s3 = inlined_call_operand.vmem [shape: f32[2,8,8,128], index: 3, kind: output, shape index: {}]  }
   0x1 LB: > { %s2616_s13 = sadd.s32 4294967295, %s2586_s12   ;;  %p2370_p0 = scmp.ge.s32.totalorder %s2586_s12, 1  ;;  %s2586_s12 = sphi %s2610_s12, %s13_s12  }
   0x2   : > { %p147_p1 = scmp.lt.s32.totalorder %s2586_s12, 3 }
   0x4   : > { %p148_p2 = pnand %p2370_p0, %p147_p1 }
   0x6   : > { %151 = sbr.rel (%p148_p2) target bundleno = 2050 (0x802), region = 32 }
   0xb   : > { %p176_p3 = scmp.lt.s32.totalorder %s2616_s13, 1  ;;  %p191_p4 = scmp.gt.s32.totalorder %s2616_s13, 0  ;;  %v3790_v0 = vmov 0.0   ;;  %v3806_v1 = vmov 0   ;;  %v2632_v2 = vld [vmem:[%s3786_s0] sm:$0xff] }
   0xc   : > { %333 = vmatprep.mubr.f32.mxu0 %v3790_v0  ;;  %404 = vmatprep.mubr.f32.mxu1 %v3790_v0  ;;  %3865 = vst [vmem:[#allocation4_spill] sm:$0xff] %v2632_v2 }
   0xd   : > { %s2625_s14 = scalar_select %p176_p3, %s2616_s13, 1  ;;  %2450 = vset.pattern.permute.xlu0 %v3806_v1  ;;  %2451 = vset.pattern.permute.xlu1 %v3806_v1 }
   0xe   : > { %s2636_s17 = scalar_select %p191_p4, 7, 0 }
   0xf   : > { %s2428_s18 = sshll.u32 %s2625_s14, 9  ;;  %s2427_s25 = sshll.u32 %s2625_s14, 8 }
  0x10   : > { %s2642_s21 = scalar_lea.vmem %s3788_s2, %s2428_s18  ;;  %v439_v3 = vstv %s2636_s17  ;;  %s2998_s28 = scalar_lea.vmem %s3787_s1, %s2427_s25 }
  0x11   : > { %v2646_v4 = vld [vmem:[%s2642_s21 + $0x1e8] sm:$0xff]  ;;  %v2649_v5 = vld [vmem:[%s2642_s21 + $0x1e0] sm:$0xff]  ;;  %vm440_vm0 = vcmp.lt.s32.totalorder %v439_v3, %v2632_v2  ;;  %v2677_v13 = vld [vmem:[%s2642_s21 + $0x1f8] sm:$0xff]  ;;  %s2815_s22 = scalar_select %p191_p4, 6, 1 }
  0x12   : > { %v2652_v6 = vld [vmem:[%s2642_s21 + $0x1c8] sm:$0xff]  ;;  %269 = vmatprep.subr.mxu0 %v2646_v4  ;;  %v2657_v7 = vld [vmem:[%s2642_s21 + $0x1c0] sm:$0xff]  ;;  %v441_v8 = vsel %vm440_vm0, 1, %v3806_v1  ;;  %340 = vmatprep.subr.mxu1 %v2677_v13  ;;  %v2685_v15 = vld [vmem:[%s2642_s21 + $0x1f0] sm:$0xff]  ;;  %s2852_s23 = scalar_select %p191_p4, 3, 4 }
  0x13   : > { %270 = vmatpush1.msra.mxu0 %v2649_v5  ;;  %v2662_v9 = vld [vmem:[%s2642_s21 + $0x1a8] sm:$0xff]  ;;  %443 = vperm.xlu0 %2450, %v441_v8   ;;  %v2666_v10 = vld [vmem:[%s2642_s21 + $0x1a0] sm:$0xff]  ;;  %v2693_v17 = vld [vmem:[%s2642_s21 + $0x1d8] sm:$0xff]  ;;  %v698_v56 = vstv %s2815_s22  ;;  %s2890_s24 = scalar_select %p191_p4, 1, 6 }
  0x14   : > { %271 = vmatprep.subr.mxu0 %v2652_v6  ;;  %v2670_v11 = vld [vmem:[%s2642_s21 + $0x188] sm:$0xff]  ;;  %v2674_v12 = vld [vmem:[%s2642_s21 + $0x180] sm:$0xff]  ;;  %341 = vmatpush1.msra.mxu1 %v2685_v15  ;;  %v2696_v18 = vld [vmem:[%s2642_s21 + $0x1d0] sm:$0xff]  ;;  %vm699_vm1 = vcmp.lt.s32.totalorder %v698_v56, %v2632_v2  ;;  %v1475_v8 = vstv %s2852_s23  ;;  %s2430_s29 = sshll.u32 %s2636_s17, 5  ;;  %s2429_s4 = sshll.u32 %s2625_s14, 6 }
  0x15   : > { %272 = vmatpush1.msra.mxu0 %v2657_v7  ;;  %v2681_v14 = vld [vmem:[%s2642_s21 + $0x168] sm:$0xff]  ;;  %v2689_v16 = vld [vmem:[%s2642_s21 + $0x160] sm:$0xff]  ;;  %342 = vmatprep.subr.mxu1 %v2693_v17  ;;  %v2704_v20 = vld [vmem:[%s2642_s21 + $0x1b8] sm:$0xff]  ;;  %vm1476_vm2 = vcmp.lt.s32.totalorder %v1475_v8, %v2632_v2  ;;  %s198_s30 = scalar_lea.vmem %s2998_s28, %s2430_s29  ;;  %s3008_s7 = scalar_lea.vmem %s3789_s3, %s2429_s4 }
  0x16   : > { %273 = vmatprep.subr.mxu0 %v2662_v9  ;;  %v2700_v19 = vld [vmem:[%s2642_s21 + $0x148] sm:$0xff]  ;;  %v2708_v21 = vld [vmem:[%s2642_s21 + $0x140] sm:$0xff]  ;;  %343 = vmatpush1.msra.mxu1 %v2696_v18  ;;  %v2712_v22 = vld [vmem:[%s2642_s21 + $0x1b0] sm:$0xff]  ;;  %s2382_s8 = sshll.u32 %s2636_s17, 3  ;;  %s2431_s16 = sshll.u32 %s2815_s22, 5 }
  0x17   : > { %274 = vmatpush1.msra.mxu0 %v2666_v10  ;;  %v2715_v23 = vld [vmem:[%s2642_s21 + $0x198] sm:$0xff]  ;;  %v2719_v24 = vld [vmem:[%s2642_s21 + $0x128] sm:$0xff]  ;;  %344 = vmatprep.subr.mxu1 %v2704_v20  ;;  %v2723_v25 = vld [vmem:[%s2642_s21 + $0x190] sm:$0xff]  ;;  %s452_s9 = scalar_lea.vmem %s3008_s7, %s2382_s8  ;;  %s457_s17 = scalar_lea.vmem %s2998_s28, %s2431_s16 }
  0x18   : > { %275 = vmatprep.subr.mxu0 %v2670_v11  ;;  %v2727_v26 = vld [vmem:[%s2642_s21 + $0x120] sm:$0xff]  ;;  %345 = vmatpush1.msra.mxu1 %v2712_v22  ;;  %v2731_v27 = vld [vmem:[%s2642_s21 + $0x178] sm:$0xff]  ;;  %v2735_v28 = vld [vmem:[%s2642_s21 + $0x108] sm:$0xff]  ;;  %s3081_s10 = scalar_select %p191_p4, 5, 2 }
  0x19   : > { %276 = vmatpush1.msra.mxu0 %v2674_v12  ;;  %346 = vmatprep.subr.mxu1 %v2715_v23  ;;  %v2739_v29 = vld [vmem:[%s2642_s21 + $0x170] sm:$0xff]  ;;  %v2743_v30 = vld [vmem:[%s2642_s21 + $0x100] sm:$0xff]  ;;  %v2747_v31 = vld [vmem:[%s2642_s21 + $0x158] sm:$0xff]  ;;  %s3085_s11 = scalar_select %p191_p4, 4, 3 }
  0x1a   : > { %277 = vmatprep.subr.mxu0 %v2681_v14  ;;  %347 = vmatpush1.msra.mxu1 %v2723_v25  ;;  %v2751_v32 = vld [vmem:[%s2642_s21 + $0xe8] sm:$0xff]  ;;  %v2755_v33 = vld [vmem:[%s2642_s21 + $0x150] sm:$0xff]  ;;  %v2759_v34 = vld [vmem:[%s2642_s21 + $0xe0] sm:$0xff]  ;;  %s3094_s14 = scalar_select %p191_p4, 2, 5 }
  0x1b   : > { %278 = vmatpush1.msra.mxu0 %v2689_v16  ;;  %348 = vmatprep.subr.mxu1 %v2731_v27  ;;  %v2763_v35 = vld [vmem:[%s2642_s21 + $0x138] sm:$0xff]  ;;  %v2767_v36 = vld [vmem:[%s2642_s21 + $0xc8] sm:$0xff]  ;;  %v2771_v37 = vld [vmem:[%s2642_s21 + $0x130] sm:$0xff]  ;;  %s3099_s15 = scalar_select %p191_p4, 0, 7 }
  0x1c   : > { %279 = vmatprep.subr.mxu0 %v2700_v19  ;;  %349 = vmatpush1.msra.mxu1 %v2739_v29  ;;  %v2775_v38 = vld [vmem:[%s2642_s21 + $0xc0] sm:$0xff]  ;;  %v2779_v39 = vld [vmem:[%s2642_s21 + $0x118] sm:$0xff]  ;;  %v2783_v40 = vld [vmem:[%s2642_s21 + $0xa8] sm:$0xff]  ;;  %s2388_s13 = sshll.u32 %s2815_s22, 3  ;;  %s2432_s19 = sshll.u32 %s3081_s10, 5 }
  0x1d   : > { %280 = vmatpush1.msra.mxu0 %v2708_v21  ;;  %350 = vmatprep.subr.mxu1 %v2747_v31  ;;  %v2787_v41 = vld [vmem:[%s2642_s21 + $0x110] sm:$0xff]  ;;  %v2791_v42 = vld [vmem:[%s2642_s21 + $0xa0] sm:$0xff]  ;;  %v2795_v43 = vld [vmem:[%s2642_s21 + $0xf8] sm:$0xff]  ;;  %s711_s18 = scalar_lea.vmem %s3008_s7, %s2388_s13  ;;  %s716_s20 = scalar_lea.vmem %s2998_s28, %s2432_s19 }
  0x1e   : > { %281 = vmatprep.subr.mxu0 %v2719_v24  ;;  %351 = vmatpush1.msra.mxu1 %v2755_v33  ;;  %v2799_v44 = vld [vmem:[%s2642_s21 + $0x88] sm:$0xff]  ;;  %v2803_v45 = vld [vmem:[%s2642_s21 + $0xf0] sm:$0xff]  ;;  %v2807_v46 = vld [vmem:[%s2642_s21 + $0x80] sm:$0xff]  ;;  %s2394_s22 = sshll.u32 %s3081_s10, 3  ;;  %s2433_s26 = sshll.u32 %s3085_s11, 5 }
  0x1f   : > { %282 = vmatpush1.msra.mxu0 %v2727_v26  ;;  %352 = vmatprep.subr.mxu1 %v2763_v35  ;;  %v2811_v47 = vld [vmem:[%s2642_s21 + $0xd8] sm:$0xff]  ;;  %v2819_v48 = vld [vmem:[%s2642_s21 + $0x68] sm:$0xff]  ;;  %v2823_v49 = vld [vmem:[%s2642_s21 + $0xd0] sm:$0xff]  ;;  %s970_s25 = scalar_lea.vmem %s3008_s7, %s2394_s22  ;;  %s975_s27 = scalar_lea.vmem %s2998_s28, %s2433_s26 }
  0x20   : > { %283 = vmatprep.subr.mxu0 %v2735_v28  ;;  %353 = vmatpush1.msra.mxu1 %v2771_v37  ;;  %3866 = vst [vmem:[#allocation5_spill] sm:$0xff] %v2819_v48  ;;  %v2827_v50 = vld [vmem:[%s2642_s21 + $0x60] sm:$0xff]  ;;  %v2831_v51 = vld [vmem:[%s2642_s21 + $0xb8] sm:$0xff]  ;;  %v2835_v52 = vld [vmem:[%s2642_s21 + $0x48] sm:$0xff]  ;;  %s2400_s29 = sshll.u32 %s3085_s11, 3  ;;  %s2434_s4 = sshll.u32 %s2852_s23, 5 }
  0x21   : > { %284 = vmatpush1.msra.mxu0 %v2743_v30  ;;  %354 = vmatprep.subr.mxu1 %v2779_v39  ;;  %3867 = vst [vmem:[#allocation6_spill] sm:$0xff] %v2827_v50  ;;  %3868 = vst [vmem:[#allocation7_spill] sm:$0xff] %v2835_v52  ;;  %v2839_v53 = vld [vmem:[%s2642_s21 + $0xb0] sm:$0xff]  ;;  %v2843_v54 = vld [vmem:[%s2642_s21 + $0x40] sm:$0xff]  ;;  %s1234_s5 = scalar_lea.vmem %s2998_s28, %s2434_s4  ;;  %s2406_s6 = sshll.u32 %s2852_s23, 3 }
  0x22   : > { %285 = vmatprep.subr.mxu0 %v2751_v32  ;;  %355 = vmatpush1.msra.mxu1 %v2787_v41  ;;  %3869 = vst [vmem:[#allocation8_spill] sm:$0xff] %v2843_v54  ;;  %v2847_v55 = vld [vmem:[%s2642_s21 + $0x98] sm:$0xff]  ;;  %v2856_v57 = vld [vmem:[%s2642_s21 + $0x28] sm:$0xff]  ;;  %v2860_v58 = vld [vmem:[%s2642_s21 + $0x90] sm:$0xff]  ;;  %s1488_s8 = scalar_lea.vmem %s3008_s7, %s2406_s6  ;;  %s2435_s23 = sshll.u32 %s3094_s14, 5 }
  0x23   : > { %286 = vmatpush1.msra.mxu0 %v2759_v34  ;;  %356 = vmatprep.subr.mxu1 %v2795_v43  ;;  %3870 = vst [vmem:[#allocation9_spill] sm:$0xff] %v2856_v57  ;;  %v2864_v59 = vld [vmem:[%s2642_s21 + $0x20] sm:$0xff]  ;;  %v2868_v60 = vld [vmem:[%s2642_s21 + $0x78] sm:$0xff]  ;;  %v2872_v61 = vld [vmem:[%s2642_s21 + $0x8] sm:$0xff]  ;;  %s2437_s13 = sshll.u32 %s3099_s15, 5 }
  0x24   : > { %287 = vmatprep.subr.mxu0 %v2767_v36  ;;  %357 = vmatpush1.msra.mxu1 %v2803_v45  ;;  %3871 = vst [vmem:[#allocation10_spill] sm:$0xff] %v2864_v59  ;;  %3872 = vst [vmem:[#allocation11_spill] sm:$0xff] %v2868_v60  ;;  %v2876_v62 = vld [vmem:[%s2642_s21 + $0x70] sm:$0xff]  ;;  %v2881_v63 = vld [vmem:[%s2642_s21] sm:$0xff] }
  0x25   : > { %288 = vmatpush1.msra.mxu0 %v2775_v38  ;;  %358 = vmatprep.subr.mxu1 %v2811_v47  ;;  %3873 = vst [vmem:[#allocation12_spill] sm:$0xff] %v2872_v61  ;;  %3874 = vst [vmem:[#allocation13_spill] sm:$0xff] %v2876_v62  ;;  %v2885_v3 = vld [vmem:[%s2642_s21 + $0x58] sm:$0xff]  ;;  %v2895_v56 = vld [vmem:[%s2642_s21 + $0x50] sm:$0xff] }
  0x26   : > { %289 = vmatprep.subr.mxu0 %v2783_v40  ;;  %359 = vmatpush1.msra.mxu1 %v2823_v49  ;;  %3875 = vst [vmem:[#allocation14_spill] sm:$0xff] %v2881_v63  ;;  %3876 = vst [vmem:[#allocation15_spill] sm:$0xff] %v2885_v3  ;;  %v2900_v0 = vld [vmem:[%s2642_s21 + $0x38] sm:$0xff] }
  0x27   : > { %290 = vmatpush1.msra.mxu0 %v2791_v42  ;;  %360 = vmatprep.subr.mxu1 %v2831_v51  ;;  %3877 = vst [vmem:[#allocation16_spill] sm:$0xff] %v2895_v56  ;;  %3878 = vst [vmem:[#allocation17_spill] sm:$0xff] %v2900_v0 }
  0x28   : > { %291 = vmatprep.subr.mxu0 %v2799_v44  ;;  %361 = vmatpush1.msra.mxu1 %v2839_v53 }
  0x29   : > { %292 = vmatpush1.msra.mxu0 %v2807_v46  ;;  %362 = vmatprep.subr.mxu1 %v2847_v55  ;;  %v3885_v8 = vld [vmem:[#allocation8_spill] sm:$0xff] }
  0x2a   : > { %293 = vmatprep.subr.mxu0 %v2819_v48  ;;  %363 = vmatpush1.msra.mxu1 %v2860_v58 }
  0x2b   : > { %294 = vmatpush1.msra.mxu0 %v2827_v50  ;;  %364 = vmatprep.subr.mxu1 %v2868_v60 }
  0x2c   : > { %295 = vmatprep.subr.mxu0 %v2835_v52  ;;  %365 = vmatpush1.msra.mxu1 %v2876_v62  ;;  %v2912_v52 = vld [vmem:[%s2642_s21 + $0x18] sm:$0xff]  ;;  %v2917_v62 = vld [vmem:[%s2642_s21 + $0x10] sm:$0xff] }
  0x2d   : > { %296 = vmatpush1.msra.mxu0 %v2843_v54  ;;  %366 = vmatprep.subr.mxu1 %v2885_v3  ;;  %v2906_v54 = vld [vmem:[%s2642_s21 + $0x30] sm:$0xff]  ;;  %3881 = vst [vmem:[#allocation19_spill] sm:$0xff] %v2912_v52  ;;  %3882 = vst [vmem:[#allocation20_spill] sm:$0xff] %v2917_v62 }
  0x2e   : > { %297 = vmatprep.subr.mxu0 %v2856_v57  ;;  %v700_v57 = vsel %vm699_vm1, 1, %v3806_v1  ;;  %3879 = vst [vmem:[#allocation18_spill] sm:$0xff] %v2906_v54  ;;  %367 = vmatpush1.msra.mxu1 %v2895_v56 }
  0x2f   : > { %298 = vmatpush1.msra.mxu0 %v2864_v59  ;;  %v3880_v59 = vmov 0.0   ;;  %368 = vmatprep.subr.mxu1 %v2900_v0 }
  0x30   : > { %299 = vmatprep.subr.mxu0 %v2872_v61  ;;  %v1993_v61 = vstv %s2890_s24  ;;  %702 = vperm.xlu0 %2450, %v700_v57  }
  0x31   : > { %300 = vmatpush1.msra.mxu0 %v2881_v63  ;;  %369 = vmatpush1.msra.mxu1 %v2906_v54  ;;  %v1477_v63 = vsel %vm1476_vm2, 1, %v3806_v1  ;;  %vm1994_vm3 = vcmp.lt.s32.totalorder %v1993_v61, %v2632_v2  ;;  %v3883_v61 = vld [vmem:[#allocation7_spill] sm:$0xff]  ;;  %v3888_v2 = vld [vmem:[#allocation12_spill] sm:$0xff] }
  0x32   : > { %334 = vmatmul.mubr.f32.vlgmr.msra.gmra.mxu0 %v3880_v59  ;;  %528 = vmatprep.subr.mxu0 %v2646_v4  ;;  %v1995_v57 = vsel %vm1994_vm3, 1, %v3806_v1  ;;  %v3887_v1 = vld [vmem:[#allocation10_spill] sm:$0xff] }
  0x33   : > { %370 = vmatprep.subr.mxu1 %v2912_v52  ;;  %529 = vmatpush1.msra.mxu0 %v2649_v5 }
  0x34   : > { %371 = vmatpush1.msra.mxu1 %v2917_v62  ;;  %530 = vmatprep.subr.mxu0 %v2652_v6 }
  0x35   : > { %405 = vmatmul.mubr.f32.vlgmr.msra.gmra.mxu1 %v3880_v59  ;;  %1479 = vperm.xlu0 %2450, %v1477_v63   ;;  %v3884_v63 = vld [vmem:[#allocation13_spill] sm:$0xff] }
  0x36   : > { %599 = vmatprep.subr.mxu1 %v2677_v13  ;;  %531 = vmatpush1.msra.mxu0 %v2657_v7 }
  0x37   : > { %600 = vmatpush1.msra.mxu1 %v2685_v15  ;;  %532 = vmatprep.subr.mxu0 %v2662_v9 }
  0x38   : > { %601 = vmatprep.subr.mxu1 %v2693_v17  ;;  %533 = vmatpush1.msra.mxu0 %v2666_v10 }
  0x39   : > { %1997 = vperm.xlu0 %2450, %v1995_v57   ;;  %602 = vmatpush1.msra.mxu1 %v2696_v18  ;;  %v3886_v57 = vld [vmem:[#allocation9_spill] sm:$0xff] }
  0x3a   : > { %603 = vmatprep.subr.mxu1 %v2704_v20  ;;  %534 = vmatprep.subr.mxu0 %v2670_v11 }
  0x3b   : > { %604 = vmatpush1.msra.mxu1 %v2712_v22  ;;  %535 = vmatpush1.msra.mxu0 %v2674_v12 }
  0x3c   : > { %605 = vmatprep.subr.mxu1 %v2715_v23  ;;  %536 = vmatprep.subr.mxu0 %v2681_v14 }
  0x3d   : > { %606 = vmatpush1.msra.mxu1 %v2723_v25  ;;  %537 = vmatpush1.msra.mxu0 %v2689_v16 }
  0x3e   : > { %607 = vmatprep.subr.mxu1 %v2731_v27  ;;  %538 = vmatprep.subr.mxu0 %v2700_v19 }
  0x3f   : > { %608 = vmatpush1.msra.mxu1 %v2739_v29  ;;  %539 = vmatpush1.msra.mxu0 %v2708_v21 }
  0x40   : > { %609 = vmatprep.subr.mxu1 %v2747_v31  ;;  %540 = vmatprep.subr.mxu0 %v2719_v24 }
  0x41   : > { %610 = vmatpush1.msra.mxu1 %v2755_v33  ;;  %541 = vmatpush1.msra.mxu0 %v2727_v26 }
  0x42   : > { %611 = vmatprep.subr.mxu1 %v2763_v35  ;;  %542 = vmatprep.subr.mxu0 %v2735_v28 }
  0x43   : > { %612 = vmatpush1.msra.mxu1 %v2771_v37  ;;  %543 = vmatpush1.msra.mxu0 %v2743_v30 }
  0x44   : > { %613 = vmatprep.subr.mxu1 %v2779_v39  ;;  %544 = vmatprep.subr.mxu0 %v2751_v32 }
  0x45   : > { %614 = vmatpush1.msra.mxu1 %v2787_v41  ;;  %545 = vmatpush1.msra.mxu0 %v2759_v34 }
  0x46   : > { %615 = vmatprep.subr.mxu1 %v2795_v43  ;;  %546 = vmatprep.subr.mxu0 %v2767_v36 }
  0x47   : > { %616 = vmatpush1.msra.mxu1 %v2803_v45  ;;  %547 = vmatpush1.msra.mxu0 %v2775_v38 }
  0x48   : > { %617 = vmatprep.subr.mxu1 %v2811_v47  ;;  %548 = vmatprep.subr.mxu0 %v2783_v40 }
  0x49   : > { %618 = vmatpush1.msra.mxu1 %v2823_v49  ;;  %549 = vmatpush1.msra.mxu0 %v2791_v42 }
  0x4a   : > { %619 = vmatprep.subr.mxu1 %v2831_v51  ;;  %550 = vmatprep.subr.mxu0 %v2799_v44 }
  0x4b   : > { %620 = vmatpush1.msra.mxu1 %v2839_v53  ;;  %551 = vmatpush1.msra.mxu0 %v2807_v46 }
  0x4c   : > { %621 = vmatprep.subr.mxu1 %v2847_v55  ;;  %552 = vmatprep.subr.mxu0 %v2819_v48 }
  0x4d   : > { %622 = vmatpush1.msra.mxu1 %v2860_v58  ;;  %553 = vmatpush1.msra.mxu0 %v2827_v50 }
  0x4e   : > { %623 = vmatprep.subr.mxu1 %v2868_v60  ;;  %554 = vmatprep.subr.mxu0 %v3883_v61  ;;  %v3889_v61 = vld [vmem:[#allocation14_spill] sm:$0xff] }
  0x4f   : > { %624 = vmatpush1.msra.mxu1 %v3884_v63  ;;  %555 = vmatpush1.msra.mxu0 %v3885_v8 }
  0x50   : > { %625 = vmatprep.subr.mxu1 %v2885_v3  ;;  %556 = vmatprep.subr.mxu0 %v3886_v57 }
  0x51   : > { %626 = vmatpush1.msra.mxu1 %v2895_v56  ;;  %557 = vmatpush1.msra.mxu0 %v3887_v1  ;;  %v201_v56 = vld [vmem:[%s198_s30 + $0x10] sm:$0xff] }
  0x52   : > { %627 = vmatprep.subr.mxu1 %v2900_v0  ;;  %558 = vmatprep.subr.mxu0 %v3888_v2  ;;  %v200_v2 = vld [vmem:[%s198_s30 + $0x8] sm:$0xff] }
  0x53   : > { %628 = vmatpush1.msra.mxu1 %v2906_v54  ;;  %559 = vmatpush1.msra.mxu0 %v3889_v61  ;;  %v199_v61 = vld [vmem:[%s198_s30] sm:$0xff] }
  0x54   : > { %629 = vmatprep.subr.mxu1 %v2912_v52  ;;  %592 = vmatprep.mubr.f32.mxu0 %v3880_v59 }
  0x55   : > { %630 = vmatpush1.msra.mxu1 %v2917_v62  ;;  %663 = vmatprep.mubr.f32.mxu1 %v3880_v59 }
  0x56   : > { %787 = vmatprep.subr.mxu0 %v2646_v4  ;;  %858 = vmatprep.subr.mxu1 %v2677_v13  ;;  %v202_v13 = vld [vmem:[%s198_s30 + $0x18] sm:$0xff]  ;;  %s1229_s30 = scalar_lea.vmem %s3008_s7, %s2400_s29 }
  0xf2   : > { %v335_v52 = vpop.f32.mrf.mxu0 }
  0xf3   : > { %v411_v54 = vadd.f32 %v335_v52, %v199_v61 }
  0xf4   : > { %v337_v62 = vpop.f32.mrf.mxu0 }
  0xf5   : > { %v2379_v1 = vmul.f32 -1.442695, %v411_v54  ;;  %v412_v59 = vadd.f32 %v337_v62, %v200_v2  ;;  %v406_v0 = vpop.f32.mrf.mxu1 }
  0xf6   : > { %v413_v3 = vadd.f32 %v406_v0, %v201_v56 }
  0xf7   : > { %2452 = vpow2.f32 %v2379_v1  ;;  %v2380_v4 = vmul.f32 -1.442695, %v412_v59  ;;  %v408_v57 = vpop.f32.mrf.mxu1  ;;  %v444_v59 = vpop.permute.xlu0 %443 }
  0xf8   : > { %v414_v8 = vadd.f32 %v408_v57, %v202_v13  ;;  %vm445_vm4 = vcmp.eq.s32.totalorder %v444_v59, 1 }
  0xf9   : > { %2454 = vpow2.f32 %v2380_v4 }
  0xfa   : > { %v2381_v63 = vmul.f32 -1.442695, %v414_v8  ;;  %2456 = vtanh.f32 %v413_v3 }
  0xfb   : > { %v703_v59 = vpop.permute.xlu0 %702 }
  0xfc   : > { %2458 = vpow2.f32 %v2381_v63  ;;  %vm704_vm9 = vcmp.eq.s32.totalorder %v703_v59, 1  ;;  %v3342_v59 = vld [vmem:[%s2642_s21 + $0x50] sm:$0xff] }
 0x104   : > { %v2453_v50 = vpop.eup %2452 }
 0x105   : > { %v418_v60 = vadd.f32 1.0, %v2453_v50 }
 0x106   : > { %v2455_v48 = vpop.eup %2454 }
 0x107   : > { %2460 = vrcp.f32 %v418_v60  ;;  %v424_v52 = vadd.f32 1.0, %v2455_v48  ;;  %v2457_v1 = vpop.eup %2456 }
 0x109   : > { %2462 = vrcp.f32 %v424_v52  ;;  %v2459_v2 = vpop.eup %2458 }
 0x10a   : > { %v431_v61 = vadd.f32 1.0, %v2459_v2 }
 0x10c   : > { %2464 = vrcp.f32 %v431_v61 }
 0x114   : > { %v2461_v54 = vpop.eup %2460 }
 0x115   : > { %v435_v57 = vmul.f32 %v2461_v54, %v2457_v1 }
 0x116   : > { %v2463_v62 = vpop.eup %2462 }
 0x117   : > { %v434_v4 = vmul.f32 0.0, %v2463_v62 }
 0x119   : > { %v436_v0 = vadd.f32 %v435_v57, %v434_v4  ;;  %v2465_v48 = vpop.eup %2464 }
 0x11b   : > { %2466 = vtanh.f32 %v436_v0  ;;  %v3002_v50 = vsel %vm445_vm4, %v436_v0, 0.0 }
 0x128   : > { %v2467_v60 = vpop.eup %2466 }
 0x129   : > { %v438_v3 = vmul.f32 %v2467_v60, %v2465_v48 }
 0x12b   : > { %v3012_v56 = vsel %vm445_vm4, %v438_v3, 0.0  ;;  %2438 = vmatmul.mubr.msk.f32.vlgmr.msra.gmra.mxu0 %vm445_vm4, %v438_v3  ;;  %2439 = vmatmul.mubr.msk.f32.vlgmr.msra.gmra.mxu1 %vm445_vm4, %v438_v3  ;;  %v3126_v3 = vld [vmem:[%s2642_s21 + $0x1f8] sm:$0xff] }
 0x12c   : > { %453 = vst [vmem:[%s452_s9] sm:$0xff] %v3012_v56  ;;  %788 = vmatpush1.msra.mxu0 %v2649_v5  ;;  %859 = vmatpush1.msra.mxu1 %v2685_v15  ;;  %v3890_v5 = vld [vmem:[#allocation5_spill] sm:$0xff]  ;;  %s1493_s9 = scalar_lea.vmem %s2998_s28, %s2435_s23 }
 0x12d   : > { %789 = vmatprep.subr.mxu0 %v2652_v6  ;;  %860 = vmatprep.subr.mxu1 %v2693_v17  ;;  %v3891_v6 = vld [vmem:[#allocation11_spill] sm:$0xff]  ;;  %v3898_v15 = vld [vmem:[#allocation9_spill] sm:$0xff]  ;;  %v3900_v17 = vld [vmem:[#allocation10_spill] sm:$0xff] }
 0x12e   : > { %790 = vmatpush1.msra.mxu0 %v2657_v7  ;;  %861 = vmatpush1.msra.mxu1 %v2696_v18  ;;  %v3892_v7 = vld [vmem:[#allocation6_spill] sm:$0xff]  ;;  %3910 = vst [vmem:[#allocation11_spill] sm:$0xff] %v3126_v3 }
 0x12f   : > { %791 = vmatprep.subr.mxu0 %v2662_v9  ;;  %862 = vmatprep.subr.mxu1 %v2704_v20  ;;  %v3893_v9 = vld [vmem:[#allocation13_spill] sm:$0xff]  ;;  %v3901_v18 = vld [vmem:[#allocation18_spill] sm:$0xff]  ;;  %v3903_v20 = vld [vmem:[#allocation19_spill] sm:$0xff] }
 0x130   : > { %792 = vmatpush1.msra.mxu0 %v2666_v10  ;;  %863 = vmatpush1.msra.mxu1 %v2712_v22  ;;  %v3894_v10 = vld [vmem:[#allocation7_spill] sm:$0xff]  ;;  %v3905_v22 = vmov 0.0  }
 0x131   : > { %793 = vmatprep.subr.mxu0 %v2670_v11  ;;  %864 = vmatprep.subr.mxu1 %v2715_v23  ;;  %v3895_v11 = vld [vmem:[#allocation15_spill] sm:$0xff]  ;;  %v3906_v23 = vld [vmem:[#allocation20_spill] sm:$0xff] }
 0x132   : > { %794 = vmatpush1.msra.mxu0 %v2674_v12  ;;  %865 = vmatpush1.msra.mxu1 %v2723_v25  ;;  %v3896_v12 = vld [vmem:[#allocation8_spill] sm:$0xff] }
 0x133   : > { %795 = vmatprep.subr.mxu0 %v2681_v14  ;;  %866 = vmatprep.subr.mxu1 %v2731_v27  ;;  %v3897_v14 = vld [vmem:[#allocation16_spill] sm:$0xff]  ;;  %v3908_v27 = vmov 0  }
 0x134   : > { %796 = vmatpush1.msra.mxu0 %v2689_v16  ;;  %867 = vmatpush1.msra.mxu1 %v2739_v29  ;;  %v3899_v16 = vld [vmem:[#allocation17_spill] sm:$0xff]  ;;  %v3907_v25 = vld [vmem:[#allocation4_spill] sm:$0xff] }
 0x135   : > { %797 = vmatprep.subr.mxu0 %v2700_v19  ;;  %868 = vmatprep.subr.mxu1 %v2747_v31  ;;  %v3902_v19 = vld [vmem:[#allocation12_spill] sm:$0xff]  ;;  %v2252_v31 = vstv %s3099_s15 }
 0x136   : > { %798 = vmatpush1.msra.mxu0 %v2708_v21  ;;  %869 = vmatpush1.msra.mxu1 %v2755_v33  ;;  %v3904_v21 = vld [vmem:[#allocation14_spill] sm:$0xff]  ;;  %vm2253_vm8 = vcmp.lt.s32.totalorder %v2252_v31, %v3907_v25  ;;  %v3227_v31 = vld [vmem:[%s2642_s21 + $0x120] sm:$0xff]  ;;  %3921 = vst [vmem:[#allocation12_spill] sm:$0xff] %v3342_v59 }
 0x137   : > { %799 = vmatprep.subr.mxu0 %v2719_v24  ;;  %870 = vmatprep.subr.mxu1 %v2763_v35  ;;  %v957_v24 = vstv %s3081_s10  ;;  %v2254_v33 = vsel %vm2253_vm8, 1, %v3908_v27  ;;  %s2412_s10 = sshll.u32 %s3094_s14, 3 }
 0x138   : > { %800 = vmatpush1.msra.mxu0 %v2727_v26  ;;  %871 = vmatpush1.msra.mxu1 %v2771_v37  ;;  %vm958_vm5 = vcmp.lt.s32.totalorder %v957_v24, %v3907_v25  ;;  %v1216_v26 = vstv %s3085_s11  ;;  %v3194_v24 = vld [vmem:[%s2642_s21 + $0x170] sm:$0xff]  ;;  %s1747_s11 = scalar_lea.vmem %s3008_s7, %s2412_s10 }
 0x139   : > { %801 = vmatprep.subr.mxu0 %v2735_v28  ;;  %872 = vmatprep.subr.mxu1 %v2779_v39  ;;  %v959_v28 = vsel %vm958_vm5, 1, %v3908_v27  ;;  %vm1217_vm6 = vcmp.lt.s32.totalorder %v1216_v26, %v3907_v25  ;;  %v3202_v26 = vld [vmem:[%s2642_s21 + $0x158] sm:$0xff] }
 0x13a   : > { %802 = vmatpush1.msra.mxu0 %v2743_v30  ;;  %873 = vmatpush1.msra.mxu1 %v2787_v41  ;;  %v1218_v29 = vsel %vm1217_vm6, 1, %v3908_v27  ;;  %v1734_v30 = vstv %s3094_s14  ;;  %s2436_s14 = sshll.u32 %s2890_s24, 5 }
 0x13b   : > { %803 = vmatprep.subr.mxu0 %v2751_v32  ;;  %874 = vmatprep.subr.mxu1 %v2795_v43  ;;  %vm1735_vm7 = vcmp.lt.s32.totalorder %v1734_v30, %v3907_v25  ;;  %v461_v43 = vld [vmem:[%s457_s17 + $0x18] sm:$0xff]  ;;  %v3199_v25 = vld [vmem:[%s2642_s21 + $0x148] sm:$0xff]  ;;  %s1752_s16 = scalar_lea.vmem %s2998_s28, %s2436_s14 }
 0x13c   : > { %804 = vmatpush1.msra.mxu0 %v2759_v34  ;;  %875 = vmatpush1.msra.mxu1 %v2803_v45  ;;  %v1736_v32 = vsel %vm1735_vm7, 1, %v3908_v27  ;;  %v458_v34 = vld [vmem:[%s457_s17] sm:$0xff]  ;;  %v3218_v30 = vld [vmem:[%s2642_s21 + $0x138] sm:$0xff] }
 0x13d   : > { %805 = vmatprep.subr.mxu0 %v2767_v36  ;;  %876 = vmatprep.subr.mxu1 %v2811_v47  ;;  %v459_v36 = vld [vmem:[%s457_s17 + $0x8] sm:$0xff]  ;;  %v3207_v27 = vld [vmem:[%s2642_s21 + $0x140] sm:$0xff] }
 0x13e   : > { %806 = vmatpush1.msra.mxu0 %v2775_v38  ;;  %877 = vmatpush1.msra.mxu1 %v2823_v49 }
 0x13f   : > { %807 = vmatprep.subr.mxu0 %v2783_v40  ;;  %878 = vmatprep.subr.mxu1 %v2831_v51 }
 0x140   : > { %808 = vmatpush1.msra.mxu0 %v2791_v42  ;;  %879 = vmatpush1.msra.mxu1 %v2839_v53 }
 0x141   : > { %809 = vmatprep.subr.mxu0 %v2799_v44  ;;  %880 = vmatprep.subr.mxu1 %v2847_v55 }
 0x142   : > { %810 = vmatpush1.msra.mxu0 %v2807_v46  ;;  %881 = vmatpush1.msra.mxu1 %v2860_v58  ;;  %v460_v46 = vld [vmem:[%s457_s17 + $0x10] sm:$0xff] }
 0x143   : > { %811 = vmatprep.subr.mxu0 %v3890_v5  ;;  %882 = vmatprep.subr.mxu1 %v3891_v6  ;;  %v3134_v5 = vld [vmem:[%s2642_s21 + $0x1f0] sm:$0xff]  ;;  %v3137_v6 = vld [vmem:[%s2642_s21 + $0x1c8] sm:$0xff] }
 0x144   : > { %812 = vmatpush1.msra.mxu0 %v3892_v7  ;;  %883 = vmatpush1.msra.mxu1 %v3893_v9  ;;  %v3140_v7 = vld [vmem:[%s2642_s21 + $0x1d8] sm:$0xff]  ;;  %v3145_v9 = vld [vmem:[%s2642_s21 + $0x1c0] sm:$0xff] }
 0x145   : > { %813 = vmatprep.subr.mxu0 %v3894_v10  ;;  %884 = vmatprep.subr.mxu1 %v3895_v11  ;;  %v3148_v10 = vld [vmem:[%s2642_s21 + $0x1d0] sm:$0xff]  ;;  %v3151_v11 = vld [vmem:[%s2642_s21 + $0x1a8] sm:$0xff] }
 0x146   : > { %814 = vmatpush1.msra.mxu0 %v3896_v12  ;;  %885 = vmatpush1.msra.mxu1 %v3897_v14  ;;  %v3156_v12 = vld [vmem:[%s2642_s21 + $0x1b8] sm:$0xff]  ;;  %v3159_v14 = vld [vmem:[%s2642_s21 + $0x1a0] sm:$0xff] }
 0x147   : > { %815 = vmatprep.subr.mxu0 %v3898_v15  ;;  %886 = vmatprep.subr.mxu1 %v3899_v16  ;;  %v3162_v15 = vld [vmem:[%s2642_s21 + $0x1b0] sm:$0xff]  ;;  %v3167_v16 = vld [vmem:[%s2642_s21 + $0x188] sm:$0xff] }
 0x148   : > { %816 = vmatpush1.msra.mxu0 %v3900_v17  ;;  %887 = vmatpush1.msra.mxu1 %v3901_v18  ;;  %v3170_v17 = vld [vmem:[%s2642_s21 + $0x198] sm:$0xff]  ;;  %v3175_v18 = vld [vmem:[%s2642_s21 + $0x180] sm:$0xff] }
 0x149   : > { %817 = vmatprep.subr.mxu0 %v3902_v19  ;;  %888 = vmatprep.subr.mxu1 %v3903_v20  ;;  %v3178_v19 = vld [vmem:[%s2642_s21 + $0x190] sm:$0xff]  ;;  %v3183_v20 = vld [vmem:[%s2642_s21 + $0x168] sm:$0xff] }
 0x14a   : > { %818 = vmatpush1.msra.mxu0 %v3904_v21  ;;  %851 = vmatprep.mubr.f32.mxu0 %v3905_v22  ;;  %v3186_v21 = vld [vmem:[%s2642_s21 + $0x178] sm:$0xff] }
 0x14b   : > { %889 = vmatpush1.msra.mxu1 %v3906_v23  ;;  %922 = vmatprep.mubr.f32.mxu1 %v3905_v22  ;;  %v3191_v23 = vld [vmem:[%s2642_s21 + $0x160] sm:$0xff] }
 0x14c   : > { %961 = vperm.xlu1 %2451, %v959_v28   ;;  %1117 = vmatprep.subr.mxu1 %v3126_v3  ;;  %v3210_v28 = vld [vmem:[%s2642_s21 + $0x150] sm:$0xff] }
 0x150   : > { %1220 = vperm.xlu1 %2451, %v1218_v29   ;;  %v3215_v29 = vld [vmem:[%s2642_s21 + $0x128] sm:$0xff] }
 0x154   : > { %1738 = vperm.xlu1 %2451, %v1736_v32   ;;  %v3230_v32 = vld [vmem:[%s2642_s21 + $0x130] sm:$0xff] }
 0x158   : > { %2256 = vperm.xlu1 %2451, %v2254_v33   ;;  %v3235_v33 = vld [vmem:[%s2642_s21 + $0x108] sm:$0xff] }
 0x1eb   : > { %v594_v35 = vpop.f32.mrf.mxu0  ;;  %v665_v41 = vpop.f32.mrf.mxu1 }
 0x1ec   : > { %v670_v37 = vadd.f32 %v594_v35, %v458_v34  ;;  %v672_v51 = vadd.f32 %v665_v41, %v460_v46  ;;  %v3238_v34 = vld [vmem:[%s2642_s21 + $0x118] sm:$0xff]  ;;  %v3243_v35 = vld [vmem:[%s2642_s21 + $0x100] sm:$0xff]  ;;  %v3267_v41 = vld [vmem:[%s2642_s21 + $0xc8] sm:$0xff] }
 0x1ed   : > { %v596_v38 = vpop.f32.mrf.mxu0  ;;  %v667_v44 = vpop.f32.mrf.mxu1  ;;  %v3286_v46 = vld [vmem:[%s2642_s21 + $0xb8] sm:$0xff] }
 0x1ee   : > { %v2385_v39 = vmul.f32 -1.442695, %v670_v37  ;;  %v671_v40 = vadd.f32 %v596_v38, %v459_v36  ;;  %v673_v45 = vadd.f32 %v667_v44, %v461_v43  ;;  %v3246_v36 = vld [vmem:[%s2642_s21 + $0x110] sm:$0xff]  ;;  %v3251_v37 = vld [vmem:[%s2642_s21 + $0xe8] sm:$0xff]  ;;  %v3254_v38 = vld [vmem:[%s2642_s21 + $0xf8] sm:$0xff] }
 0x1ef   : > { %v3275_v43 = vld [vmem:[%s2642_s21 + $0xc0] sm:$0xff]  ;;  %v3278_v44 = vld [vmem:[%s2642_s21 + $0xd0] sm:$0xff] }
 0x1f0   : > { %2468 = vpow2.f32 %v2385_v39  ;;  %v2386_v42 = vmul.f32 -1.442695, %v671_v40  ;;  %v2387_v47 = vmul.f32 -1.442695, %v673_v45  ;;  %v3259_v39 = vld [vmem:[%s2642_s21 + $0xe0] sm:$0xff]  ;;  %v3262_v40 = vld [vmem:[%s2642_s21 + $0xf0] sm:$0xff] }
 0x1f1   : > { %v3283_v45 = vld [vmem:[%s2642_s21 + $0xa8] sm:$0xff] }
 0x1f2   : > { %2470 = vpow2.f32 %v2386_v42  ;;  %v3270_v42 = vld [vmem:[%s2642_s21 + $0xd8] sm:$0xff] }
 0x1f3   : > { %2472 = vpow2.f32 %v2387_v47  ;;  %v3291_v47 = vld [vmem:[%s2642_s21 + $0xa0] sm:$0xff] }
 0x1fd   : > { %v2469_v49 = vpop.eup %2468 }
 0x1fe   : > { %v677_v53 = vadd.f32 1.0, %v2469_v49  ;;  %v3294_v49 = vld [vmem:[%s2642_s21 + $0xb0] sm:$0xff] }
 0x1ff   : > { %v2471_v55 = vpop.eup %2470 }
 0x200   : > { %2474 = vrcp.f32 %v677_v53  ;;  %v683_v58 = vadd.f32 1.0, %v2471_v55  ;;  %v2473_v63 = vpop.eup %2472  ;;  %v3302_v53 = vld [vmem:[%s2642_s21 + $0x98] sm:$0xff]  ;;  %v3307_v55 = vld [vmem:[%s2642_s21 + $0x80] sm:$0xff] }
 0x201   : > { %2476 = vtanh.f32 %v672_v51  ;;  %v690_v1 = vadd.f32 1.0, %v2473_v63  ;;  %v3299_v51 = vld [vmem:[%s2642_s21 + $0x88] sm:$0xff]  ;;  %3911 = vst [vmem:[#allocation6_spill] sm:$0xff] %v3302_v53  ;;  %3912 = vst [vmem:[#allocation13_spill] sm:$0xff] %v3307_v55 }
 0x202   : > { %2478 = vrcp.f32 %v683_v58  ;;  %v3310_v58 = vld [vmem:[%s2642_s21 + $0x90] sm:$0xff]  ;;  %v3315_v63 = vld [vmem:[%s2642_s21 + $0x68] sm:$0xff] }
 0x203   : > { %2480 = vrcp.f32 %v690_v1  ;;  %3913 = vst [vmem:[#allocation7_spill] sm:$0xff] %v3310_v58  ;;  %3914 = vst [vmem:[#allocation15_spill] sm:$0xff] %v3315_v63  ;;  %v3331_v1 = vld [vmem:[%s2642_s21 + $0x48] sm:$0xff] }
 0x204   : > { %3918 = vst [vmem:[#allocation17_spill] sm:$0xff] %v3331_v1 }
 0x20d   : > { %v2475_v8 = vpop.eup %2474 }
 0x20e   : > { %v2477_v13 = vpop.eup %2476 }
 0x20f   : > { %v2479_v52 = vpop.eup %2478  ;;  %v694_v2 = vmul.f32 %v2477_v13, %v2475_v8  ;;  %v3318_v8 = vld [vmem:[%s2642_s21 + $0x78] sm:$0xff]  ;;  %v3323_v13 = vld [vmem:[%s2642_s21 + $0x60] sm:$0xff] }
 0x210   : > { %v693_v54 = vmul.f32 %v2479_v52, %v3002_v50  ;;  %v2481_v4 = vpop.eup %2480  ;;  %3915 = vst [vmem:[#allocation8_spill] sm:$0xff] %v3318_v8  ;;  %3916 = vst [vmem:[#allocation16_spill] sm:$0xff] %v3323_v13  ;;  %v3326_v52 = vld [vmem:[%s2642_s21 + $0x70] sm:$0xff] }
 0x211   : > { %3917 = vst [vmem:[#allocation9_spill] sm:$0xff] %v3326_v52 }
 0x212   : > { %v695_v62 = vadd.f32 %v694_v2, %v693_v54  ;;  %v3334_v2 = vld [vmem:[%s2642_s21 + $0x58] sm:$0xff]  ;;  %v3339_v54 = vld [vmem:[%s2642_s21 + $0x40] sm:$0xff] }
 0x213   : > { %3919 = vst [vmem:[#allocation10_spill] sm:$0xff] %v3334_v2  ;;  %3920 = vst [vmem:[#allocation18_spill] sm:$0xff] %v3339_v54 }
 0x214   : > { %2482 = vtanh.f32 %v695_v62  ;;  %v3111_v61 = vsel %vm704_vm9, %v695_v62, %v3002_v50  ;;  %v3123_v50 = vld [vmem:[%s2642_s21 + $0x1e8] sm:$0xff] }
 0x215   : > { %3909 = vst [vmem:[#allocation5_spill] sm:$0xff] %v3123_v50  ;;  %1046 = vmatprep.subr.mxu0 %v3123_v50  ;;  %v3347_v62 = vld [vmem:[%s2642_s21 + $0x28] sm:$0xff] }
 0x216   : > { %3922 = vst [vmem:[#allocation19_spill] sm:$0xff] %v3347_v62 }
 0x221   : > { %v2483_v57 = vpop.eup %2482 }
 0x222   : > { %v697_v0 = vmul.f32 %v2483_v57, %v2481_v4  ;;  %v3350_v4 = vld [vmem:[%s2642_s21 + $0x38] sm:$0xff]  ;;  %v3355_v57 = vld [vmem:[%s2642_s21 + $0x20] sm:$0xff] }
 0x223   : > { %3923 = vst [vmem:[#allocation14_spill] sm:$0xff] %v3350_v4  ;;  %3924 = vst [vmem:[#allocation20_spill] sm:$0xff] %v3355_v57 }
 0x224   : > { %v3116_v48 = vsel %vm704_vm9, %v697_v0, %v3012_v56  ;;  %v709_v60 = vsel %vm704_vm9, %v697_v0, 0.0  ;;  %v3129_v56 = vld [vmem:[%s2642_s21 + $0x1e0] sm:$0xff]  ;;  %v3358_v0 = vld [vmem:[%s2642_s21 + $0x30] sm:$0xff] }
 0x225   : > { %712 = vst [vmem:[%s711_s18] sm:$0xff] %v709_v60  ;;  %852 = vmatmul.mubr.f32.vlgmr.msra.gmra.mxu0 %v3116_v48  ;;  %923 = vmatmul.mubr.f32.vlgmr.msra.gmra.mxu1 %v3116_v48  ;;  %3925 = vst [vmem:[#allocation4_spill] sm:$0xff] %v3358_v0  ;;  %v3363_v60 = vld [vmem:[%s2642_s21 + $0x8] sm:$0xff]  ;;  %s2011_s18 = scalar_lea.vmem %s2998_s28, %s2437_s13 }
 0x226   : > { %1110 = vmatprep.mubr.f32.mxu0 %v3905_v22  ;;  %1181 = vmatprep.mubr.f32.mxu1 %v3905_v22  ;;  %3926 = vst [vmem:[#allocation21_spill] sm:$0xff] %v3363_v60  ;;  %v3366_v22 = vld [vmem:[%s2642_s21 + $0x18] sm:$0xff] }
 0x227   : > { %1047 = vmatpush1.msra.mxu0 %v3129_v56  ;;  %1118 = vmatpush1.msra.mxu1 %v3134_v5  ;;  %3927 = vst [vmem:[#allocation22_spill] sm:$0xff] %v3366_v22 }
 0x228   : > { %1048 = vmatprep.subr.mxu0 %v3137_v6  ;;  %1119 = vmatprep.subr.mxu1 %v3140_v7 }
 0x229   : > { %1049 = vmatpush1.msra.mxu0 %v3145_v9  ;;  %1120 = vmatpush1.msra.mxu1 %v3148_v10 }
 0x22a   : > { %1050 = vmatprep.subr.mxu0 %v3151_v11  ;;  %1121 = vmatprep.subr.mxu1 %v3156_v12 }
 0x22b   : > { %1051 = vmatpush1.msra.mxu0 %v3159_v14  ;;  %1122 = vmatpush1.msra.mxu1 %v3162_v15 }
 0x22c   : > { %1052 = vmatprep.subr.mxu0 %v3167_v16  ;;  %1123 = vmatprep.subr.mxu1 %v3170_v17 }
 0x22d   : > { %1053 = vmatpush1.msra.mxu0 %v3175_v18  ;;  %1124 = vmatpush1.msra.mxu1 %v3178_v19 }
 0x22e   : > { %1054 = vmatprep.subr.mxu0 %v3183_v20  ;;  %1125 = vmatprep.subr.mxu1 %v3186_v21 }
 0x22f   : > { %1055 = vmatpush1.msra.mxu0 %v3191_v23  ;;  %1126 = vmatpush1.msra.mxu1 %v3194_v24 }
 0x230   : > { %1056 = vmatprep.subr.mxu0 %v3199_v25  ;;  %1127 = vmatprep.subr.mxu1 %v3202_v26 }
 0x231   : > { %1057 = vmatpush1.msra.mxu0 %v3207_v27  ;;  %1128 = vmatpush1.msra.mxu1 %v3210_v28 }
 0x232   : > { %1058 = vmatprep.subr.mxu0 %v3215_v29  ;;  %1129 = vmatprep.subr.mxu1 %v3218_v30 }
 0x233   : > { %1059 = vmatpush1.msra.mxu0 %v3227_v31  ;;  %1130 = vmatpush1.msra.mxu1 %v3230_v32 }
 0x234   : > { %1060 = vmatprep.subr.mxu0 %v3235_v33  ;;  %1131 = vmatprep.subr.mxu1 %v3238_v34 }
 0x235   : > { %1061 = vmatpush1.msra.mxu0 %v3243_v35  ;;  %1132 = vmatpush1.msra.mxu1 %v3246_v36 }
 0x236   : > { %1062 = vmatprep.subr.mxu0 %v3251_v37  ;;  %1133 = vmatprep.subr.mxu1 %v3254_v38 }
 0x237   : > { %1063 = vmatpush1.msra.mxu0 %v3259_v39  ;;  %1134 = vmatpush1.msra.mxu1 %v3262_v40 }
 0x238   : > { %1064 = vmatprep.subr.mxu0 %v3267_v41  ;;  %1135 = vmatprep.subr.mxu1 %v3270_v42 }
 0x239   : > { %1065 = vmatpush1.msra.mxu0 %v3275_v43  ;;  %1136 = vmatpush1.msra.mxu1 %v3278_v44 }
 0x23a   : > { %1066 = vmatprep.subr.mxu0 %v3283_v45  ;;  %1137 = vmatprep.subr.mxu1 %v3286_v46 }
 0x23b   : > { %1067 = vmatpush1.msra.mxu0 %v3291_v47  ;;  %1138 = vmatpush1.msra.mxu1 %v3294_v49 }
 0x23c   : > { %1068 = vmatprep.subr.mxu0 %v3299_v51  ;;  %1139 = vmatprep.subr.mxu1 %v3302_v53 }
 0x23d   : > { %1069 = vmatpush1.msra.mxu0 %v3307_v55  ;;  %1140 = vmatpush1.msra.mxu1 %v3310_v58 }
 0x23e   : > { %1070 = vmatprep.subr.mxu0 %v3315_v63  ;;  %1141 = vmatprep.subr.mxu1 %v3318_v8  ;;  %v719_v8 = vld [vmem:[%s716_s20 + $0x10] sm:$0xff] }
 0x23f   : > { %1071 = vmatpush1.msra.mxu0 %v3323_v13  ;;  %1142 = vmatpush1.msra.mxu1 %v3326_v52 }
 0x240   : > { %1072 = vmatprep.subr.mxu0 %v3331_v1  ;;  %1143 = vmatprep.subr.mxu1 %v3334_v2 }
 0x241   : > { %1073 = vmatpush1.msra.mxu0 %v3339_v54  ;;  %1144 = vmatpush1.msra.mxu1 %v3342_v59  ;;  %v718_v59 = vld [vmem:[%s716_s20 + $0x8] sm:$0xff] }
 0x242   : > { %1074 = vmatprep.subr.mxu0 %v3347_v62  ;;  %1145 = vmatprep.subr.mxu1 %v3350_v4  ;;  %v3371_v62 = vld [vmem:[%s2642_s21] sm:$0xff]  ;;  %v3374_v4 = vld [vmem:[%s2642_s21 + $0x10] sm:$0xff] }
 0x243   : > { %1075 = vmatpush1.msra.mxu0 %v3355_v57  ;;  %1146 = vmatpush1.msra.mxu1 %v3358_v0  ;;  %3928 = vst [vmem:[#allocation23_spill] sm:$0xff] %v3371_v62  ;;  %3929 = vst [vmem:[#allocation24_spill] sm:$0xff] %v3374_v4  ;;  %v717_v0 = vld [vmem:[%s716_s20] sm:$0xff] }
 0x244   : > { %1076 = vmatprep.subr.mxu0 %v3363_v60  ;;  %1147 = vmatprep.subr.mxu1 %v3366_v22 }
 0x245   : > { %1077 = vmatpush1.msra.mxu0 %v3371_v62  ;;  %1148 = vmatpush1.msra.mxu1 %v3374_v4  ;;  %v720_v62 = vld [vmem:[%s716_s20 + $0x18] sm:$0xff] }
 0x246   : > { %1305 = vmatprep.subr.mxu0 %v3123_v50  ;;  %1376 = vmatprep.subr.mxu1 %v3126_v3 }
 0x2e5   : > { %v853_v57 = vpop.f32.mrf.mxu0  ;;  %v924_v1 = vpop.f32.mrf.mxu1 }
 0x2e6   : > { %v929_v60 = vadd.f32 %v853_v57, %v717_v0  ;;  %v931_v3 = vadd.f32 %v924_v1, %v719_v8  ;;  %v3932_v1 = vld [vmem:[#allocation7_spill] sm:$0xff]  ;;  %v3934_v0 = vld [vmem:[#allocation8_spill] sm:$0xff] }
 0x2e7   : > { %v855_v54 = vpop.f32.mrf.mxu0  ;;  %v926_v13 = vpop.f32.mrf.mxu1 }
 0x2e8   : > { %v2391_v22 = vmul.f32 -1.442695, %v929_v60  ;;  %v930_v2 = vadd.f32 %v855_v54, %v718_v59  ;;  %v932_v4 = vadd.f32 %v926_v13, %v720_v62  ;;  %v3935_v60 = vld [vmem:[#allocation16_spill] sm:$0xff] }
 0x2ea   : > { %2484 = vpow2.f32 %v2391_v22  ;;  %v2392_v52 = vmul.f32 -1.442695, %v930_v2  ;;  %v2393_v50 = vmul.f32 -1.442695, %v932_v4  ;;  %v3933_v4 = vld [vmem:[#allocation15_spill] sm:$0xff] }
 0x2ec   : > { %2486 = vpow2.f32 %v2392_v52  ;;  %v962_v52 = vpop.permute.xlu1 %961 }
 0x2ed   : > { %2488 = vpow2.f32 %v2393_v50  ;;  %vm963_vm10 = vcmp.eq.s32.totalorder %v962_v52, 1  ;;  %v3939_v52 = vld [vmem:[#allocation18_spill] sm:$0xff] }
 0x2f7   : > { %v2485_v63 = vpop.eup %2484 }
 0x2f8   : > { %v936_v58 = vadd.f32 1.0, %v2485_v63 }
 0x2f9   : > { %v2487_v55 = vpop.eup %2486 }
 0x2fa   : > { %2490 = vrcp.f32 %v936_v58  ;;  %v942_v53 = vadd.f32 1.0, %v2487_v55  ;;  %v2489_v54 = vpop.eup %2488 }
 0x2fb   : > { %2492 = vtanh.f32 %v931_v3  ;;  %v949_v57 = vadd.f32 1.0, %v2489_v54  ;;  %v3936_v54 = vld [vmem:[#allocation9_spill] sm:$0xff] }
 0x2fc   : > { %2494 = vrcp.f32 %v942_v53 }
 0x2fd   : > { %2496 = vrcp.f32 %v949_v57  ;;  %v3941_v57 = vld [vmem:[#allocation19_spill] sm:$0xff] }
 0x307   : > { %v2491_v22 = vpop.eup %2490 }
 0x308   : > { %v2493_v2 = vpop.eup %2492 }
 0x309   : > { %v2495_v59 = vpop.eup %2494  ;;  %v953_v62 = vmul.f32 %v2493_v2, %v2491_v22  ;;  %v3937_v22 = vld [vmem:[#allocation17_spill] sm:$0xff]  ;;  %v3938_v2 = vld [vmem:[#allocation10_spill] sm:$0xff] }
 0x30a   : > { %v952_v13 = vmul.f32 %v2495_v59, %v3111_v61  ;;  %v2497_v3 = vpop.eup %2496  ;;  %v3940_v59 = vld [vmem:[#allocation12_spill] sm:$0xff] }
 0x30c   : > { %v954_v8 = vadd.f32 %v953_v62, %v952_v13  ;;  %v3942_v13 = vld [vmem:[#allocation14_spill] sm:$0xff]  ;;  %v3943_v62 = vld [vmem:[#allocation20_spill] sm:$0xff] }
 0x30e   : > { %2498 = vtanh.f32 %v954_v8  ;;  %v3384_v50 = vsel %vm963_vm10, %v954_v8, %v3111_v61  ;;  %v3930_v61 = vld [vmem:[#allocation6_spill] sm:$0xff]  ;;  %v3944_v8 = vld [vmem:[#allocation4_spill] sm:$0xff] }
 0x31b   : > { %v2499_v53 = vpop.eup %2498 }
 0x31c   : > { %v956_v55 = vmul.f32 %v2499_v53, %v2497_v3  ;;  %v3945_v3 = vld [vmem:[#allocation21_spill] sm:$0xff]  ;;  %v3946_v53 = vld [vmem:[#allocation22_spill] sm:$0xff] }
 0x31e   : > { %v3389_v58 = vsel %vm963_vm10, %v956_v55, %v3116_v48  ;;  %v968_v63 = vsel %vm963_vm10, %v956_v55, 0.0  ;;  %v3931_v48 = vld [vmem:[#allocation13_spill] sm:$0xff]  ;;  %v3947_v55 = vld [vmem:[#allocation23_spill] sm:$0xff] }
 0x31f   : > { %971 = vst [vmem:[%s970_s25] sm:$0xff] %v968_v63  ;;  %1111 = vmatmul.mubr.f32.vlgmr.msra.gmra.mxu0 %v3389_v58  ;;  %1182 = vmatmul.mubr.f32.vlgmr.msra.gmra.mxu1 %v3389_v58  ;;  %v3948_v63 = vmov 0.0  }
 0x320   : > { %1306 = vmatpush1.msra.mxu0 %v3129_v56  ;;  %1377 = vmatpush1.msra.mxu1 %v3134_v5 }
 0x321   : > { %1307 = vmatprep.subr.mxu0 %v3137_v6  ;;  %1378 = vmatprep.subr.mxu1 %v3140_v7 }
 0x322   : > { %1308 = vmatpush1.msra.mxu0 %v3145_v9  ;;  %1379 = vmatpush1.msra.mxu1 %v3148_v10 }
 0x323   : > { %1309 = vmatprep.subr.mxu0 %v3151_v11  ;;  %1380 = vmatprep.subr.mxu1 %v3156_v12 }
 0x324   : > { %1310 = vmatpush1.msra.mxu0 %v3159_v14  ;;  %1381 = vmatpush1.msra.mxu1 %v3162_v15 }
 0x325   : > { %1311 = vmatprep.subr.mxu0 %v3167_v16  ;;  %1382 = vmatprep.subr.mxu1 %v3170_v17 }
 0x326   : > { %1312 = vmatpush1.msra.mxu0 %v3175_v18  ;;  %1383 = vmatpush1.msra.mxu1 %v3178_v19 }
 0x327   : > { %1313 = vmatprep.subr.mxu0 %v3183_v20  ;;  %1384 = vmatprep.subr.mxu1 %v3186_v21 }
 0x328   : > { %1314 = vmatpush1.msra.mxu0 %v3191_v23  ;;  %1385 = vmatpush1.msra.mxu1 %v3194_v24 }
 0x329   : > { %1315 = vmatprep.subr.mxu0 %v3199_v25  ;;  %1386 = vmatprep.subr.mxu1 %v3202_v26 }
 0x32a   : > { %1316 = vmatpush1.msra.mxu0 %v3207_v27  ;;  %1387 = vmatpush1.msra.mxu1 %v3210_v28 }
 0x32b   : > { %1317 = vmatprep.subr.mxu0 %v3215_v29  ;;  %1388 = vmatprep.subr.mxu1 %v3218_v30 }
 0x32c   : > { %1318 = vmatpush1.msra.mxu0 %v3227_v31  ;;  %1389 = vmatpush1.msra.mxu1 %v3230_v32 }
 0x32d   : > { %1319 = vmatprep.subr.mxu0 %v3235_v33  ;;  %1390 = vmatprep.subr.mxu1 %v3238_v34 }
 0x32e   : > { %1320 = vmatpush1.msra.mxu0 %v3243_v35  ;;  %1391 = vmatpush1.msra.mxu1 %v3246_v36 }
 0x32f   : > { %1321 = vmatprep.subr.mxu0 %v3251_v37  ;;  %1392 = vmatprep.subr.mxu1 %v3254_v38 }
 0x330   : > { %1322 = vmatpush1.msra.mxu0 %v3259_v39  ;;  %1393 = vmatpush1.msra.mxu1 %v3262_v40 }
 0x331   : > { %1323 = vmatprep.subr.mxu0 %v3267_v41  ;;  %1394 = vmatprep.subr.mxu1 %v3270_v42 }
 0x332   : > { %1324 = vmatpush1.msra.mxu0 %v3275_v43  ;;  %1395 = vmatpush1.msra.mxu1 %v3278_v44 }
 0x333   : > { %1325 = vmatprep.subr.mxu0 %v3283_v45  ;;  %1396 = vmatprep.subr.mxu1 %v3286_v46 }
 0x334   : > { %1326 = vmatpush1.msra.mxu0 %v3291_v47  ;;  %1397 = vmatpush1.msra.mxu1 %v3294_v49 }
 0x335   : > { %1327 = vmatprep.subr.mxu0 %v3299_v51  ;;  %1398 = vmatprep.subr.mxu1 %v3930_v61 }
 0x336   : > { %1328 = vmatpush1.msra.mxu0 %v3931_v48  ;;  %1399 = vmatpush1.msra.mxu1 %v3932_v1 }
 0x337   : > { %1329 = vmatprep.subr.mxu0 %v3933_v4  ;;  %1400 = vmatprep.subr.mxu1 %v3934_v0  ;;  %v978_v0 = vld [vmem:[%s975_s27 + $0x10] sm:$0xff] }
 0x338   : > { %1330 = vmatpush1.msra.mxu0 %v3935_v60  ;;  %1401 = vmatpush1.msra.mxu1 %v3936_v54 }
 0x339   : > { %1331 = vmatprep.subr.mxu0 %v3937_v22  ;;  %1402 = vmatprep.subr.mxu1 %v3938_v2  ;;  %v3949_v2 = vld [vmem:[#allocation24_spill] sm:$0xff] }
 0x33a   : > { %1332 = vmatpush1.msra.mxu0 %v3939_v52  ;;  %1403 = vmatpush1.msra.mxu1 %v3940_v59  ;;  %v3950_v59 = vld [vmem:[#allocation5_spill] sm:$0xff] }
 0x33b   : > { %1333 = vmatprep.subr.mxu0 %v3941_v57  ;;  %1404 = vmatprep.subr.mxu1 %v3942_v13  ;;  %v3951_v57 = vld [vmem:[#allocation11_spill] sm:$0xff]  ;;  %v977_v13 = vld [vmem:[%s975_s27 + $0x8] sm:$0xff] }
 0x33c   : > { %1334 = vmatpush1.msra.mxu0 %v3943_v62  ;;  %1405 = vmatpush1.msra.mxu1 %v3944_v8  ;;  %v976_v62 = vld [vmem:[%s975_s27] sm:$0xff] }
 0x33d   : > { %1335 = vmatprep.subr.mxu0 %v3945_v3  ;;  %1406 = vmatprep.subr.mxu1 %v3946_v53 }
 0x33e   : > { %1336 = vmatpush1.msra.mxu0 %v3947_v55  ;;  %1369 = vmatprep.mubr.f32.mxu0 %v3948_v63 }
 0x33f   : > { %1407 = vmatpush1.msra.mxu1 %v3949_v2  ;;  %1440 = vmatprep.mubr.f32.mxu1 %v3948_v63  ;;  %v979_v2 = vld [vmem:[%s975_s27 + $0x18] sm:$0xff] }
 0x340   : > { %1564 = vmatprep.subr.mxu0 %v3950_v59  ;;  %1635 = vmatprep.subr.mxu1 %v3951_v57 }
 0x3df   : > { %v1112_v8 = vpop.f32.mrf.mxu0  ;;  %v1183_v55 = vpop.f32.mrf.mxu1 }
 0x3e0   : > { %v1188_v3 = vadd.f32 %v1112_v8, %v976_v62  ;;  %v1190_v57 = vadd.f32 %v1183_v55, %v978_v0 }
 0x3e1   : > { %v1114_v52 = vpop.f32.mrf.mxu0  ;;  %v1185_v60 = vpop.f32.mrf.mxu1 }
 0x3e2   : > { %v2397_v53 = vmul.f32 -1.442695, %v1188_v3  ;;  %v1189_v22 = vadd.f32 %v1114_v52, %v977_v13  ;;  %v1191_v63 = vadd.f32 %v1185_v60, %v979_v2  ;;  %v1221_v2 = vpop.permute.xlu1 %1220 }
 0x3e3   : > { %vm1222_vm11 = vcmp.eq.s32.totalorder %v1221_v2, 1 }
 0x3e4   : > { %2500 = vpow2.f32 %v2397_v53  ;;  %v2398_v54 = vmul.f32 -1.442695, %v1189_v22  ;;  %v2399_v59 = vmul.f32 -1.442695, %v1191_v63 }
 0x3e6   : > { %2502 = vpow2.f32 %v2398_v54 }
 0x3e7   : > { %2504 = vpow2.f32 %v2399_v59 }
 0x3f1   : > { %v2501_v4 = vpop.eup %2500 }
 0x3f2   : > { %v1195_v1 = vadd.f32 1.0, %v2501_v4 }
 0x3f3   : > { %v2503_v48 = vpop.eup %2502 }
 0x3f4   : > { %2506 = vrcp.f32 %v1195_v1  ;;  %v1201_v61 = vadd.f32 1.0, %v2503_v48  ;;  %v2505_v52 = vpop.eup %2504 }
 0x3f5   : > { %2508 = vtanh.f32 %v1190_v57  ;;  %v1208_v62 = vadd.f32 1.0, %v2505_v52  ;;  %v1238_v57 = vld [vmem:[%s1234_s5 + $0x18] sm:$0xff] }
 0x3f6   : > { %2510 = vrcp.f32 %v1201_v61 }
 0x3f7   : > { %2512 = vrcp.f32 %v1208_v62 }
 0x401   : > { %v2507_v13 = vpop.eup %2506 }
 0x402   : > { %v2509_v22 = vpop.eup %2508 }
 0x403   : > { %v2511_v54 = vpop.eup %2510  ;;  %v1212_v8 = vmul.f32 %v2509_v22, %v2507_v13  ;;  %v1237_v22 = vld [vmem:[%s1234_s5 + $0x10] sm:$0xff] }
 0x404   : > { %v1211_v60 = vmul.f32 %v2511_v54, %v3384_v50  ;;  %v2513_v48 = vpop.eup %2512 }
 0x406   : > { %v1213_v3 = vadd.f32 %v1212_v8, %v1211_v60 }
 0x408   : > { %2514 = vtanh.f32 %v1213_v3  ;;  %v3463_v1 = vsel %vm1222_vm11, %v1213_v3, %v3384_v50 }
 0x415   : > { %v2515_v61 = vpop.eup %2514 }
 0x416   : > { %v1215_v4 = vmul.f32 %v2515_v61, %v2513_v48 }
 0x418   : > { %v3468_v0 = vsel %vm1222_vm11, %v1215_v4, %v3389_v58  ;;  %v1227_v53 = vsel %vm1222_vm11, %v1215_v4, 0.0 }
 0x419   : > { %1230 = vst [vmem:[%s1229_s30] sm:$0xff] %v1227_v53  ;;  %1370 = vmatmul.mubr.f32.vlgmr.msra.gmra.mxu0 %v3468_v0  ;;  %1441 = vmatmul.mubr.f32.vlgmr.msra.gmra.mxu1 %v3468_v0 }
 0x41a   : > { %1565 = vmatpush1.msra.mxu0 %v3129_v56  ;;  %1636 = vmatpush1.msra.mxu1 %v3134_v5  ;;  %v3952_v56 = vld [vmem:[#allocation6_spill] sm:$0xff]  ;;  %v3953_v5 = vld [vmem:[#allocation13_spill] sm:$0xff] }
 0x41b   : > { %1566 = vmatprep.subr.mxu0 %v3137_v6  ;;  %1637 = vmatprep.subr.mxu1 %v3140_v7  ;;  %v3954_v6 = vld [vmem:[#allocation7_spill] sm:$0xff] }
 0x41c   : > { %1567 = vmatpush1.msra.mxu0 %v3145_v9  ;;  %1638 = vmatpush1.msra.mxu1 %v3148_v10  ;;  %v3955_v7 = vld [vmem:[#allocation15_spill] sm:$0xff]  ;;  %v3956_v9 = vld [vmem:[#allocation8_spill] sm:$0xff] }
 0x41d   : > { %1568 = vmatprep.subr.mxu0 %v3151_v11  ;;  %1639 = vmatprep.subr.mxu1 %v3156_v12  ;;  %v3957_v10 = vld [vmem:[#allocation16_spill] sm:$0xff]  ;;  %v3958_v11 = vld [vmem:[#allocation9_spill] sm:$0xff] }
 0x41e   : > { %1569 = vmatpush1.msra.mxu0 %v3159_v14  ;;  %1640 = vmatpush1.msra.mxu1 %v3162_v15  ;;  %v3959_v12 = vld [vmem:[#allocation17_spill] sm:$0xff]  ;;  %v3960_v14 = vld [vmem:[#allocation10_spill] sm:$0xff] }
 0x41f   : > { %1570 = vmatprep.subr.mxu0 %v3167_v16  ;;  %1641 = vmatprep.subr.mxu1 %v3170_v17  ;;  %v3961_v15 = vld [vmem:[#allocation18_spill] sm:$0xff]  ;;  %v3962_v16 = vld [vmem:[#allocation12_spill] sm:$0xff]  ;;  %v3963_v17 = vld [vmem:[#allocation19_spill] sm:$0xff] }
 0x420   : > { %1571 = vmatpush1.msra.mxu0 %v3175_v18  ;;  %1642 = vmatpush1.msra.mxu1 %v3178_v19  ;;  %v3964_v18 = vld [vmem:[#allocation14_spill] sm:$0xff]  ;;  %v3965_v19 = vld [vmem:[#allocation20_spill] sm:$0xff] }
 0x421   : > { %1572 = vmatprep.subr.mxu0 %v3183_v20  ;;  %1643 = vmatprep.subr.mxu1 %v3186_v21  ;;  %v3966_v20 = vld [vmem:[#allocation4_spill] sm:$0xff]  ;;  %v3967_v21 = vld [vmem:[#allocation21_spill] sm:$0xff] }
 0x422   : > { %1573 = vmatpush1.msra.mxu0 %v3191_v23  ;;  %1644 = vmatpush1.msra.mxu1 %v3194_v24  ;;  %v3968_v23 = vld [vmem:[#allocation22_spill] sm:$0xff]  ;;  %v3969_v24 = vld [vmem:[#allocation23_spill] sm:$0xff] }
 0x423   : > { %1574 = vmatprep.subr.mxu0 %v3199_v25  ;;  %1645 = vmatprep.subr.mxu1 %v3202_v26  ;;  %v3970_v25 = vmov 0.0   ;;  %v3971_v26 = vld [vmem:[#allocation24_spill] sm:$0xff] }
 0x424   : > { %1575 = vmatpush1.msra.mxu0 %v3207_v27  ;;  %1646 = vmatpush1.msra.mxu1 %v3210_v28  ;;  %v1235_v27 = vld [vmem:[%s1234_s5] sm:$0xff] }
 0x425   : > { %1576 = vmatprep.subr.mxu0 %v3215_v29  ;;  %1647 = vmatprep.subr.mxu1 %v3218_v30  ;;  %v1236_v29 = vld [vmem:[%s1234_s5 + $0x8] sm:$0xff] }
 0x426   : > { %1577 = vmatpush1.msra.mxu0 %v3227_v31  ;;  %1648 = vmatpush1.msra.mxu1 %v3230_v32 }
 0x427   : > { %1578 = vmatprep.subr.mxu0 %v3235_v33  ;;  %1649 = vmatprep.subr.mxu1 %v3238_v34 }
 0x428   : > { %1579 = vmatpush1.msra.mxu0 %v3243_v35  ;;  %1650 = vmatpush1.msra.mxu1 %v3246_v36 }
 0x429   : > { %1580 = vmatprep.subr.mxu0 %v3251_v37  ;;  %1651 = vmatprep.subr.mxu1 %v3254_v38 }
 0x42a   : > { %1581 = vmatpush1.msra.mxu0 %v3259_v39  ;;  %1652 = vmatpush1.msra.mxu1 %v3262_v40 }
 0x42b   : > { %1582 = vmatprep.subr.mxu0 %v3267_v41  ;;  %1653 = vmatprep.subr.mxu1 %v3270_v42 }
 0x42c   : > { %1583 = vmatpush1.msra.mxu0 %v3275_v43  ;;  %1654 = vmatpush1.msra.mxu1 %v3278_v44 }
 0x42d   : > { %1584 = vmatprep.subr.mxu0 %v3283_v45  ;;  %1655 = vmatprep.subr.mxu1 %v3286_v46 }
 0x42e   : > { %1585 = vmatpush1.msra.mxu0 %v3291_v47  ;;  %1656 = vmatpush1.msra.mxu1 %v3294_v49 }
 0x42f   : > { %1586 = vmatprep.subr.mxu0 %v3299_v51  ;;  %1657 = vmatprep.subr.mxu1 %v3952_v56 }
 0x430   : > { %1587 = vmatpush1.msra.mxu0 %v3953_v5  ;;  %1658 = vmatpush1.msra.mxu1 %v3954_v6 }
 0x431   : > { %1588 = vmatprep.subr.mxu0 %v3955_v7  ;;  %1659 = vmatprep.subr.mxu1 %v3956_v9 }
 0x432   : > { %1589 = vmatpush1.msra.mxu0 %v3957_v10  ;;  %1660 = vmatpush1.msra.mxu1 %v3958_v11 }
 0x433   : > { %1590 = vmatprep.subr.mxu0 %v3959_v12  ;;  %1661 = vmatprep.subr.mxu1 %v3960_v14 }
 0x434   : > { %1591 = vmatpush1.msra.mxu0 %v3961_v15  ;;  %1662 = vmatpush1.msra.mxu1 %v3962_v16 }
 0x435   : > { %1592 = vmatprep.subr.mxu0 %v3963_v17  ;;  %1663 = vmatprep.subr.mxu1 %v3964_v18 }
 0x436   : > { %1593 = vmatpush1.msra.mxu0 %v3965_v19  ;;  %1664 = vmatpush1.msra.mxu1 %v3966_v20 }
 0x437   : > { %1594 = vmatprep.subr.mxu0 %v3967_v21  ;;  %1665 = vmatprep.subr.mxu1 %v3968_v23 }
 0x438   : > { %1595 = vmatpush1.msra.mxu0 %v3969_v24  ;;  %1628 = vmatprep.mubr.f32.mxu0 %v3970_v25 }
 0x439   : > { %1666 = vmatpush1.msra.mxu1 %v3971_v26  ;;  %1699 = vmatprep.mubr.f32.mxu1 %v3970_v25 }
 0x4d9   : > { %v1371_v28 = vpop.f32.mrf.mxu0  ;;  %v1442_v63 = vpop.f32.mrf.mxu1 }
 0x4da   : > { %v1447_v30 = vadd.f32 %v1371_v28, %v1235_v27  ;;  %v1449_v8 = vadd.f32 %v1442_v63, %v1237_v22  ;;  %v3563_v22 = vld [vmem:[%s2642_s21 + $0x1f0] sm:$0xff] }
 0x4db   : > { %v1373_v50 = vpop.f32.mrf.mxu0  ;;  %v1444_v52 = vpop.f32.mrf.mxu1 }
 0x4dc   : > { %v2403_v58 = vmul.f32 -1.442695, %v1447_v30  ;;  %v1448_v55 = vadd.f32 %v1373_v50, %v1236_v29  ;;  %v1450_v13 = vadd.f32 %v1444_v52, %v1238_v57  ;;  %v1480_v30 = vpop.permute.xlu0 %1479 }
 0x4dd   : > { %vm1481_vm12 = vcmp.eq.s32.totalorder %v1480_v30, 1  ;;  %v3619_v30 = vld [vmem:[%s2642_s21 + $0x178] sm:$0xff] }
 0x4de   : > { %2516 = vpow2.f32 %v2403_v58  ;;  %v2404_v59 = vmul.f32 -1.442695, %v1448_v55  ;;  %v2405_v54 = vmul.f32 -1.442695, %v1450_v13  ;;  %v3555_v13 = vld [vmem:[%s2642_s21 + $0x1f8] sm:$0xff]  ;;  %3972 = vst [vmem:[#allocation5_spill] sm:$0xff] %v3619_v30 }
 0x4df   : > { %1894 = vmatprep.subr.mxu1 %v3555_v13 }
 0x4e0   : > { %2518 = vpow2.f32 %v2404_v59 }
 0x4e1   : > { %2520 = vpow2.f32 %v2405_v54  ;;  %v3568_v54 = vld [vmem:[%s2642_s21 + $0x1c8] sm:$0xff] }
 0x4eb   : > { %v2517_v62 = vpop.eup %2516 }
 0x4ec   : > { %v1454_v60 = vadd.f32 1.0, %v2517_v62  ;;  %v3571_v62 = vld [vmem:[%s2642_s21 + $0x1d8] sm:$0xff] }
 0x4ed   : > { %v2519_v2 = vpop.eup %2518 }
 0x4ee   : > { %2522 = vrcp.f32 %v1454_v60  ;;  %v1460_v3 = vadd.f32 1.0, %v2519_v2  ;;  %v2521_v48 = vpop.eup %2520  ;;  %v3579_v60 = vld [vmem:[%s2642_s21 + $0x1d0] sm:$0xff]  ;;  %v3584_v2 = vld [vmem:[%s2642_s21 + $0x1a8] sm:$0xff] }
 0x4ef   : > { %2524 = vtanh.f32 %v1449_v8  ;;  %v1467_v27 = vadd.f32 1.0, %v2521_v48  ;;  %v3576_v8 = vld [vmem:[%s2642_s21 + $0x1c0] sm:$0xff] }
 0x4f0   : > { %2526 = vrcp.f32 %v1460_v3  ;;  %v3587_v3 = vld [vmem:[%s2642_s21 + $0x1b8] sm:$0xff]  ;;  %v3592_v48 = vld [vmem:[%s2642_s21 + $0x1a0] sm:$0xff] }
 0x4f1   : > { %2528 = vrcp.f32 %v1467_v27  ;;  %v3608_v27 = vld [vmem:[%s2642_s21 + $0x180] sm:$0xff] }
 0x4fb   : > { %v2523_v61 = vpop.eup %2522 }
 0x4fc   : > { %v2525_v4 = vpop.eup %2524 }
 0x4fd   : > { %v2527_v53 = vpop.eup %2526  ;;  %v1471_v28 = vmul.f32 %v2525_v4, %v2523_v61  ;;  %v3595_v61 = vld [vmem:[%s2642_s21 + $0x1b0] sm:$0xff]  ;;  %v3600_v4 = vld [vmem:[%s2642_s21 + $0x188] sm:$0xff] }
 0x4fe   : > { %v1470_v29 = vmul.f32 %v2527_v53, %v3463_v1  ;;  %v2529_v55 = vpop.eup %2528  ;;  %v3603_v53 = vld [vmem:[%s2642_s21 + $0x198] sm:$0xff] }
 0x500   : > { %v1472_v50 = vadd.f32 %v1471_v28, %v1470_v29  ;;  %v3611_v28 = vld [vmem:[%s2642_s21 + $0x190] sm:$0xff]  ;;  %v3616_v29 = vld [vmem:[%s2642_s21 + $0x168] sm:$0xff] }
 0x502   : > { %2530 = vtanh.f32 %v1472_v50  ;;  %v3540_v58 = vsel %vm1481_vm12, %v1472_v50, %v3463_v1  ;;  %v3552_v1 = vld [vmem:[%s2642_s21 + $0x1e8] sm:$0xff]  ;;  %v3624_v50 = vld [vmem:[%s2642_s21 + $0x160] sm:$0xff] }
 0x503   : > { %1823 = vmatprep.subr.mxu0 %v3552_v1  ;;  %3973 = vst [vmem:[#allocation11_spill] sm:$0xff] %v3624_v50 }
 0x50f   : > { %v2531_v63 = vpop.eup %2530 }
 0x510   : > { %v1474_v59 = vmul.f32 %v2531_v63, %v2529_v55  ;;  %v3627_v55 = vld [vmem:[%s2642_s21 + $0x170] sm:$0xff]  ;;  %v3632_v63 = vld [vmem:[%s2642_s21 + $0x148] sm:$0xff] }
 0x512   : > { %v3545_v57 = vsel %vm1481_vm12, %v1474_v59, %v3468_v0  ;;  %v1486_v52 = vsel %vm1481_vm12, %v1474_v59, 0.0  ;;  %v3560_v0 = vld [vmem:[%s2642_s21 + $0x1e0] sm:$0xff]  ;;  %v3635_v59 = vld [vmem:[%s2642_s21 + $0x158] sm:$0xff] }
 0x513   : > { %1489 = vst [vmem:[%s1488_s8] sm:$0xff] %v1486_v52  ;;  %1629 = vmatmul.mubr.f32.vlgmr.msra.gmra.mxu0 %v3545_v57  ;;  %1700 = vmatmul.mubr.f32.vlgmr.msra.gmra.mxu1 %v3545_v57  ;;  %v3640_v52 = vld [vmem:[%s2642_s21 + $0x140] sm:$0xff] }
 0x514   : > { %1887 = vmatprep.mubr.f32.mxu0 %v3970_v25  ;;  %1958 = vmatprep.mubr.f32.mxu1 %v3970_v25  ;;  %v3643_v25 = vld [vmem:[%s2642_s21 + $0x150] sm:$0xff] }
 0x515   : > { %1824 = vmatpush1.msra.mxu0 %v3560_v0  ;;  %1895 = vmatpush1.msra.mxu1 %v3563_v22 }
 0x516   : > { %1825 = vmatprep.subr.mxu0 %v3568_v54  ;;  %1896 = vmatprep.subr.mxu1 %v3571_v62 }
 0x517   : > { %1826 = vmatpush1.msra.mxu0 %v3576_v8  ;;  %1897 = vmatpush1.msra.mxu1 %v3579_v60 }
 0x518   : > { %1827 = vmatprep.subr.mxu0 %v3584_v2  ;;  %1898 = vmatprep.subr.mxu1 %v3587_v3 }
 0x519   : > { %1828 = vmatpush1.msra.mxu0 %v3592_v48  ;;  %1899 = vmatpush1.msra.mxu1 %v3595_v61 }
 0x51a   : > { %1829 = vmatprep.subr.mxu0 %v3600_v4  ;;  %1900 = vmatprep.subr.mxu1 %v3603_v53 }
 0x51b   : > { %1830 = vmatpush1.msra.mxu0 %v3608_v27  ;;  %1901 = vmatpush1.msra.mxu1 %v3611_v28 }
 0x51c   : > { %1831 = vmatprep.subr.mxu0 %v3616_v29  ;;  %1902 = vmatprep.subr.mxu1 %v3619_v30  ;;  %v3648_v30 = vld [vmem:[%s2642_s21 + $0x128] sm:$0xff] }
 0x51d   : > { %1832 = vmatpush1.msra.mxu0 %v3624_v50  ;;  %1903 = vmatpush1.msra.mxu1 %v3627_v55  ;;  %v3651_v50 = vld [vmem:[%s2642_s21 + $0x138] sm:$0xff] }
 0x51e   : > { %1833 = vmatprep.subr.mxu0 %v3632_v63  ;;  %1904 = vmatprep.subr.mxu1 %v3635_v59 }
 0x51f   : > { %1834 = vmatpush1.msra.mxu0 %v3640_v52  ;;  %1905 = vmatpush1.msra.mxu1 %v3643_v25 }
 0x520   : > { %1835 = vmatprep.subr.mxu0 %v3648_v30  ;;  %1906 = vmatprep.subr.mxu1 %v3651_v50 }
 0x521   : > { %1836 = vmatpush1.msra.mxu0 %v3227_v31  ;;  %1907 = vmatpush1.msra.mxu1 %v3230_v32  ;;  %v1494_v31 = vld [vmem:[%s1493_s9] sm:$0xff] }
 0x522   : > { %1837 = vmatprep.subr.mxu0 %v3235_v33  ;;  %1908 = vmatprep.subr.mxu1 %v3238_v34  ;;  %v1495_v33 = vld [vmem:[%s1493_s9 + $0x8] sm:$0xff] }
 0x523   : > { %1838 = vmatpush1.msra.mxu0 %v3243_v35  ;;  %1909 = vmatpush1.msra.mxu1 %v3246_v36 }
 0x524   : > { %1839 = vmatprep.subr.mxu0 %v3251_v37  ;;  %1910 = vmatprep.subr.mxu1 %v3254_v38 }
 0x525   : > { %1840 = vmatpush1.msra.mxu0 %v3259_v39  ;;  %1911 = vmatpush1.msra.mxu1 %v3262_v40  ;;  %v1497_v40 = vld [vmem:[%s1493_s9 + $0x18] sm:$0xff] }
 0x526   : > { %1841 = vmatprep.subr.mxu0 %v3267_v41  ;;  %1912 = vmatprep.subr.mxu1 %v3270_v42 }
 0x527   : > { %1842 = vmatpush1.msra.mxu0 %v3275_v43  ;;  %1913 = vmatpush1.msra.mxu1 %v3278_v44  ;;  %v1496_v43 = vld [vmem:[%s1493_s9 + $0x10] sm:$0xff] }
 0x528   : > { %1843 = vmatprep.subr.mxu0 %v3283_v45  ;;  %1914 = vmatprep.subr.mxu1 %v3286_v46 }
 0x529   : > { %1844 = vmatpush1.msra.mxu0 %v3291_v47  ;;  %1915 = vmatpush1.msra.mxu1 %v3294_v49 }
 0x52a   : > { %1845 = vmatprep.subr.mxu0 %v3299_v51  ;;  %1916 = vmatprep.subr.mxu1 %v3952_v56 }
 0x52b   : > { %1846 = vmatpush1.msra.mxu0 %v3953_v5  ;;  %1917 = vmatpush1.msra.mxu1 %v3954_v6 }
 0x52c   : > { %1847 = vmatprep.subr.mxu0 %v3955_v7  ;;  %1918 = vmatprep.subr.mxu1 %v3956_v9 }
 0x52d   : > { %1848 = vmatpush1.msra.mxu0 %v3957_v10  ;;  %1919 = vmatpush1.msra.mxu1 %v3958_v11 }
 0x52e   : > { %1849 = vmatprep.subr.mxu0 %v3959_v12  ;;  %1920 = vmatprep.subr.mxu1 %v3960_v14  ;;  %v1739_v12 = vpop.permute.xlu1 %1738 }
 0x52f   : > { %1850 = vmatpush1.msra.mxu0 %v3961_v15  ;;  %1921 = vmatpush1.msra.mxu1 %v3962_v16  ;;  %vm1740_vm13 = vcmp.eq.s32.totalorder %v1739_v12, 1 }
 0x530   : > { %1851 = vmatprep.subr.mxu0 %v3963_v17  ;;  %1922 = vmatprep.subr.mxu1 %v3964_v18 }
 0x531   : > { %1852 = vmatpush1.msra.mxu0 %v3965_v19  ;;  %1923 = vmatpush1.msra.mxu1 %v3966_v20 }
 0x532   : > { %1853 = vmatprep.subr.mxu0 %v3967_v21  ;;  %1924 = vmatprep.subr.mxu1 %v3968_v23  ;;  %v3974_v21 = vld [vmem:[#allocation5_spill] sm:$0xff]  ;;  %v3975_v23 = vld [vmem:[#allocation11_spill] sm:$0xff] }
 0x533   : > { %1854 = vmatpush1.msra.mxu0 %v3969_v24  ;;  %1925 = vmatpush1.msra.mxu1 %v3971_v26  ;;  %v3976_v24 = vmov 0.0   ;;  %v2054_v26 = vld [vmem:[%s2642_s21 + $0x120] sm:$0xff] }
 0x534   : > { %2082 = vmatprep.subr.mxu0 %v3552_v1  ;;  %2153 = vmatprep.subr.mxu1 %v3555_v13  ;;  %v2050_v1 = vld [vmem:[%s2642_s21 + $0x100] sm:$0xff]  ;;  %v2052_v13 = vld [vmem:[%s2642_s21 + $0x110] sm:$0xff] }
 0x5d3   : > { %v1630_v32 = vpop.f32.mrf.mxu0  ;;  %v1701_v38 = vpop.f32.mrf.mxu1 }
 0x5d4   : > { %v1706_v34 = vadd.f32 %v1630_v32, %v1494_v31  ;;  %v1708_v46 = vadd.f32 %v1701_v38, %v1496_v43  ;;  %v2029_v31 = vld [vmem:[%s2642_s21 + $0x58] sm:$0xff]  ;;  %v2026_v32 = vld [vmem:[%s2642_s21 + $0x40] sm:$0xff]  ;;  %v2019_v38 = vld [vmem:[%s2642_s21 + $0x8] sm:$0xff] }
 0x5d5   : > { %v1632_v35 = vpop.f32.mrf.mxu0  ;;  %v1703_v41 = vpop.f32.mrf.mxu1 }
 0x5d6   : > { %v2409_v36 = vmul.f32 -1.442695, %v1706_v34  ;;  %v1707_v37 = vadd.f32 %v1632_v35, %v1495_v33  ;;  %v1709_v42 = vadd.f32 %v1703_v41, %v1497_v40  ;;  %v2028_v33 = vld [vmem:[%s2642_s21 + $0x50] sm:$0xff]  ;;  %v2023_v34 = vld [vmem:[%s2642_s21 + $0x28] sm:$0xff]  ;;  %v2025_v35 = vld [vmem:[%s2642_s21 + $0x38] sm:$0xff] }
 0x5d7   : > { %v2018_v40 = vld [vmem:[%s2642_s21] sm:$0xff]  ;;  %v2020_v41 = vld [vmem:[%s2642_s21 + $0x10] sm:$0xff] }
 0x5d8   : > { %2532 = vpow2.f32 %v2409_v36  ;;  %v2410_v39 = vmul.f32 -1.442695, %v1707_v37  ;;  %v2411_v44 = vmul.f32 -1.442695, %v1709_v42  ;;  %v2022_v36 = vld [vmem:[%s2642_s21 + $0x20] sm:$0xff]  ;;  %v2024_v37 = vld [vmem:[%s2642_s21 + $0x30] sm:$0xff] }
 0x5d9   : > { %v1753_v42 = vld [vmem:[%s1752_s16] sm:$0xff] }
 0x5da   : > { %2534 = vpow2.f32 %v2410_v39  ;;  %v2021_v39 = vld [vmem:[%s2642_s21 + $0x18] sm:$0xff] }
 0x5db   : > { %2536 = vpow2.f32 %v2411_v44  ;;  %v1754_v44 = vld [vmem:[%s1752_s16 + $0x8] sm:$0xff] }
 0x5e5   : > { %v2533_v45 = vpop.eup %2532 }
 0x5e6   : > { %v1713_v47 = vadd.f32 1.0, %v2533_v45 }
 0x5e7   : > { %v2535_v49 = vpop.eup %2534 }
 0x5e8   : > { %2538 = vrcp.f32 %v1713_v47  ;;  %v1719_v51 = vadd.f32 1.0, %v2535_v49  ;;  %v2537_v56 = vpop.eup %2536 }
 0x5e9   : > { %2540 = vtanh.f32 %v1708_v46  ;;  %v1726_v9 = vadd.f32 1.0, %v2537_v56 }
 0x5ea   : > { %2542 = vrcp.f32 %v1719_v51 }
 0x5eb   : > { %2544 = vrcp.f32 %v1726_v9  ;;  %v1755_v9 = vld [vmem:[%s1752_s16 + $0x10] sm:$0xff] }
 0x5f5   : > { %v2539_v5 = vpop.eup %2538 }
 0x5f6   : > { %v2541_v6 = vpop.eup %2540 }
 0x5f7   : > { %v2543_v7 = vpop.eup %2542  ;;  %v1730_v10 = vmul.f32 %v2541_v6, %v2539_v5  ;;  %v1756_v5 = vld [vmem:[%s1752_s16 + $0x18] sm:$0xff] }
 0x5f8   : > { %v1729_v11 = vmul.f32 %v2543_v7, %v3540_v58  ;;  %v2545_v16 = vpop.eup %2544 }
 0x5fa   : > { %v1731_v14 = vadd.f32 %v1730_v10, %v1729_v11 }
 0x5fc   : > { %2546 = vtanh.f32 %v1731_v14  ;;  %v3699_v15 = vsel %vm1740_vm13, %v1731_v14, %v3540_v58  ;;  %v2056_v58 = vld [vmem:[%s2642_s21 + $0x130] sm:$0xff] }
 0x609   : > { %v2547_v17 = vpop.eup %2546 }
 0x60a   : > { %v1733_v18 = vmul.f32 %v2547_v17, %v2545_v16 }
 0x60c   : > { %v3704_v19 = vsel %vm1740_vm13, %v1733_v18, %v3545_v57  ;;  %v1745_v20 = vsel %vm1740_vm13, %v1733_v18, 0.0  ;;  %v2051_v57 = vld [vmem:[%s2642_s21 + $0x108] sm:$0xff] }
 0x60d   : > { %1748 = vst [vmem:[%s1747_s11] sm:$0xff] %v1745_v20  ;;  %1888 = vmatmul.mubr.f32.vlgmr.msra.gmra.mxu0 %v3704_v19  ;;  %1959 = vmatmul.mubr.f32.vlgmr.msra.gmra.mxu1 %v3704_v19 }
 0x60e   : > { %2083 = vmatpush1.msra.mxu0 %v3560_v0  ;;  %2154 = vmatpush1.msra.mxu1 %v3563_v22  ;;  %v2047_v0 = vld [vmem:[%s2642_s21 + $0xe8] sm:$0xff]  ;;  %v2049_v22 = vld [vmem:[%s2642_s21 + $0xf8] sm:$0xff] }
 0x60f   : > { %2084 = vmatprep.subr.mxu0 %v3568_v54  ;;  %2155 = vmatprep.subr.mxu1 %v3571_v62  ;;  %v2046_v54 = vld [vmem:[%s2642_s21 + $0xe0] sm:$0xff]  ;;  %v2048_v62 = vld [vmem:[%s2642_s21 + $0xf0] sm:$0xff] }
 0x610   : > { %2085 = vmatpush1.msra.mxu0 %v3576_v8  ;;  %2156 = vmatpush1.msra.mxu1 %v3579_v60  ;;  %v2043_v8 = vld [vmem:[%s2642_s21 + $0xc8] sm:$0xff]  ;;  %v2045_v60 = vld [vmem:[%s2642_s21 + $0xd8] sm:$0xff] }
 0x611   : > { %2086 = vmatprep.subr.mxu0 %v3584_v2  ;;  %2157 = vmatprep.subr.mxu1 %v3587_v3  ;;  %v2042_v2 = vld [vmem:[%s2642_s21 + $0xc0] sm:$0xff]  ;;  %v2044_v3 = vld [vmem:[%s2642_s21 + $0xd0] sm:$0xff] }
 0x612   : > { %2087 = vmatpush1.msra.mxu0 %v3592_v48  ;;  %2158 = vmatpush1.msra.mxu1 %v3595_v61  ;;  %v2039_v48 = vld [vmem:[%s2642_s21 + $0xa8] sm:$0xff]  ;;  %v2041_v61 = vld [vmem:[%s2642_s21 + $0xb8] sm:$0xff] }
 0x613   : > { %2088 = vmatprep.subr.mxu0 %v3600_v4  ;;  %2159 = vmatprep.subr.mxu1 %v3603_v53  ;;  %v2038_v4 = vld [vmem:[%s2642_s21 + $0xa0] sm:$0xff]  ;;  %v2040_v53 = vld [vmem:[%s2642_s21 + $0xb0] sm:$0xff] }
 0x614   : > { %2089 = vmatpush1.msra.mxu0 %v3608_v27  ;;  %2160 = vmatpush1.msra.mxu1 %v3611_v28  ;;  %v2035_v27 = vld [vmem:[%s2642_s21 + $0x88] sm:$0xff]  ;;  %v2037_v28 = vld [vmem:[%s2642_s21 + $0x98] sm:$0xff] }
 0x615   : > { %2090 = vmatprep.subr.mxu0 %v3616_v29  ;;  %2161 = vmatprep.subr.mxu1 %v3974_v21  ;;  %v2034_v29 = vld [vmem:[%s2642_s21 + $0x80] sm:$0xff] }
 0x616   : > { %2091 = vmatpush1.msra.mxu0 %v3975_v23  ;;  %2162 = vmatpush1.msra.mxu1 %v3627_v55  ;;  %v2033_v55 = vld [vmem:[%s2642_s21 + $0x78] sm:$0xff] }
 0x617   : > { %2092 = vmatprep.subr.mxu0 %v3632_v63  ;;  %2163 = vmatprep.subr.mxu1 %v3635_v59  ;;  %v2030_v63 = vld [vmem:[%s2642_s21 + $0x60] sm:$0xff]  ;;  %v2032_v59 = vld [vmem:[%s2642_s21 + $0x70] sm:$0xff] }
 0x618   : > { %2093 = vmatpush1.msra.mxu0 %v3640_v52  ;;  %2164 = vmatpush1.msra.mxu1 %v3643_v25  ;;  %v2053_v25 = vld [vmem:[%s2642_s21 + $0x118] sm:$0xff]  ;;  %v2027_v52 = vld [vmem:[%s2642_s21 + $0x48] sm:$0xff] }
 0x619   : > { %2094 = vmatprep.subr.mxu0 %v3648_v30  ;;  %2165 = vmatprep.subr.mxu1 %v3651_v50  ;;  %v2036_v30 = vld [vmem:[%s2642_s21 + $0x90] sm:$0xff]  ;;  %v2031_v50 = vld [vmem:[%s2642_s21 + $0x68] sm:$0xff]  ;;  %s2418_s21 = sshll.u32 %s2890_s24, 3  ;;  %s2424_s24 = sshll.u32 %s3099_s15, 3 }
 0x61a   : > { %2146 = vmatprep.mubr.f32.mxu0 %v3976_v24  ;;  %2217 = vmatprep.mubr.f32.mxu1 %v3976_v24  ;;  %s2006_s17 = scalar_lea.vmem %s3008_s7, %s2418_s21  ;;  %s2265_s28 = scalar_lea.vmem %s3008_s7, %s2424_s24 }
 0x61b   : > { %2095 = vmatpush1.msra.mxu0 %v2054_v26  ;;  %2166 = vmatpush1.msra.mxu1 %v2056_v58  ;;  %v1998_v26 = vpop.permute.xlu0 %1997 }
 0x61c   : > { %2096 = vmatprep.subr.mxu0 %v2051_v57  ;;  %2167 = vmatprep.subr.mxu1 %v2053_v25  ;;  %vm1999_vm14 = vcmp.eq.s32.totalorder %v1998_v26, 1 }
 0x61d   : > { %2097 = vmatpush1.msra.mxu0 %v2050_v1  ;;  %2168 = vmatpush1.msra.mxu1 %v2052_v13 }
 0x61e   : > { %2098 = vmatprep.subr.mxu0 %v2047_v0  ;;  %2169 = vmatprep.subr.mxu1 %v2049_v22 }
 0x61f   : > { %2099 = vmatpush1.msra.mxu0 %v2046_v54  ;;  %2170 = vmatpush1.msra.mxu1 %v2048_v62 }
 0x620   : > { %2100 = vmatprep.subr.mxu0 %v2043_v8  ;;  %2171 = vmatprep.subr.mxu1 %v2045_v60  ;;  %v2012_v8 = vld [vmem:[%s2011_s18] sm:$0xff] }
 0x621   : > { %2101 = vmatpush1.msra.mxu0 %v2042_v2  ;;  %2172 = vmatpush1.msra.mxu1 %v2044_v3  ;;  %v2013_v2 = vld [vmem:[%s2011_s18 + $0x8] sm:$0xff] }
 0x622   : > { %2102 = vmatprep.subr.mxu0 %v2039_v48  ;;  %2173 = vmatprep.subr.mxu1 %v2041_v61 }
 0x623   : > { %2103 = vmatpush1.msra.mxu0 %v2038_v4  ;;  %2174 = vmatpush1.msra.mxu1 %v2040_v53 }
 0x624   : > { %2104 = vmatprep.subr.mxu0 %v2035_v27  ;;  %2175 = vmatprep.subr.mxu1 %v2037_v28  ;;  %v2015_v27 = vld [vmem:[%s2011_s18 + $0x18] sm:$0xff] }
 0x625   : > { %2105 = vmatpush1.msra.mxu0 %v2034_v29  ;;  %2176 = vmatpush1.msra.mxu1 %v2036_v30  ;;  %v2014_v29 = vld [vmem:[%s2011_s18 + $0x10] sm:$0xff] }
 0x626   : > { %2106 = vmatprep.subr.mxu0 %v2031_v50  ;;  %2177 = vmatprep.subr.mxu1 %v2033_v55 }
 0x627   : > { %2107 = vmatpush1.msra.mxu0 %v2030_v63  ;;  %2178 = vmatpush1.msra.mxu1 %v2032_v59 }
 0x628   : > { %2108 = vmatprep.subr.mxu0 %v2027_v52  ;;  %2179 = vmatprep.subr.mxu1 %v2029_v31 }
 0x629   : > { %2109 = vmatpush1.msra.mxu0 %v2026_v32  ;;  %2180 = vmatpush1.msra.mxu1 %v2028_v33 }
 0x62a   : > { %2110 = vmatprep.subr.mxu0 %v2023_v34  ;;  %2181 = vmatprep.subr.mxu1 %v2025_v35 }
 0x62b   : > { %2111 = vmatpush1.msra.mxu0 %v2022_v36  ;;  %2182 = vmatpush1.msra.mxu1 %v2024_v37 }
 0x62c   : > { %2112 = vmatprep.subr.mxu0 %v2019_v38  ;;  %2183 = vmatprep.subr.mxu1 %v2021_v39 }
 0x62d   : > { %2113 = vmatpush1.msra.mxu0 %v2018_v40  ;;  %2184 = vmatpush1.msra.mxu1 %v2020_v41  ;;  %v2257_v40 = vpop.permute.xlu1 %2256 }
 0x62e   : > { %vm2258_vm15 = vcmp.eq.s32.totalorder %v2257_v40, 1 }
 0x6cd   : > { %v1889_v43 = vpop.f32.mrf.mxu0  ;;  %v1960_v51 = vpop.f32.mrf.mxu1 }
 0x6ce   : > { %v1965_v45 = vadd.f32 %v1889_v43, %v1753_v42  ;;  %v1967_v12 = vadd.f32 %v1960_v51, %v1755_v9 }
 0x6cf   : > { %v1891_v46 = vpop.f32.mrf.mxu0  ;;  %v1962_v6 = vpop.f32.mrf.mxu1 }
 0x6d0   : > { %v2415_v47 = vmul.f32 -1.442695, %v1965_v45  ;;  %v1966_v49 = vadd.f32 %v1891_v46, %v1754_v44  ;;  %v1968_v7 = vadd.f32 %v1962_v6, %v1756_v5 }
 0x6d2   : > { %2548 = vpow2.f32 %v2415_v47  ;;  %v2416_v56 = vmul.f32 -1.442695, %v1966_v49  ;;  %v2417_v10 = vmul.f32 -1.442695, %v1968_v7 }
 0x6d4   : > { %2550 = vpow2.f32 %v2416_v56 }
 0x6d5   : > { %2552 = vpow2.f32 %v2417_v10 }
 0x6df   : > { %v2549_v11 = vpop.eup %2548 }
 0x6e0   : > { %v1972_v14 = vadd.f32 1.0, %v2549_v11 }
 0x6e1   : > { %v2551_v16 = vpop.eup %2550 }
 0x6e2   : > { %2554 = vrcp.f32 %v1972_v14  ;;  %v1978_v17 = vadd.f32 1.0, %v2551_v16  ;;  %v2553_v18 = vpop.eup %2552 }
 0x6e3   : > { %2556 = vtanh.f32 %v1967_v12  ;;  %v1985_v24 = vadd.f32 1.0, %v2553_v18 }
 0x6e4   : > { %2558 = vrcp.f32 %v1978_v17 }
 0x6e5   : > { %2560 = vrcp.f32 %v1985_v24 }
 0x6ef   : > { %v2555_v20 = vpop.eup %2554 }
 0x6f0   : > { %v2557_v21 = vpop.eup %2556 }
 0x6f1   : > { %v2559_v23 = vpop.eup %2558  ;;  %v1989_v58 = vmul.f32 %v2557_v21, %v2555_v20 }
 0x6f2   : > { %v1988_v57 = vmul.f32 %v2559_v23, %v3699_v15  ;;  %v2561_v13 = vpop.eup %2560 }
 0x6f4   : > { %v1990_v25 = vadd.f32 %v1989_v58, %v1988_v57 }
 0x6f6   : > { %2562 = vtanh.f32 %v1990_v25  ;;  %v2002_v1 = vsel %vm1999_vm14, %v1990_v25, %v3699_v15 }
 0x703   : > { %v2563_v0 = vpop.eup %2562 }
 0x704   : > { %v1992_v22 = vmul.f32 %v2563_v0, %v2561_v13 }
 0x706   : > { %v2000_v54 = vsel %vm1999_vm14, %v1992_v22, %v3704_v19  ;;  %v2004_v62 = vsel %vm1999_vm14, %v1992_v22, 0.0 }
 0x707   : > { %2007 = vst [vmem:[%s2006_s17] sm:$0xff] %v2004_v62  ;;  %2147 = vmatmul.mubr.f32.vlgmr.msra.gmra.mxu0 %v2000_v54  ;;  %2218 = vmatmul.mubr.f32.vlgmr.msra.gmra.mxu1 %v2000_v54 }
 0x7c7   : > { %v2148_v60 = vpop.f32.mrf.mxu0  ;;  %v2219_v4 = vpop.f32.mrf.mxu1 }
 0x7c8   : > { %v2224_v3 = vadd.f32 %v2148_v60, %v2012_v8  ;;  %v2226_v55 = vadd.f32 %v2219_v4, %v2014_v29 }
 0x7c9   : > { %v2150_v48 = vpop.f32.mrf.mxu0  ;;  %v2221_v28 = vpop.f32.mrf.mxu1 }
 0x7ca   : > { %v2421_v61 = vmul.f32 -1.442695, %v2224_v3  ;;  %v2225_v15 = vadd.f32 %v2150_v48, %v2013_v2  ;;  %v2227_v19 = vadd.f32 %v2221_v28, %v2015_v27 }
 0x7cc   : > { %2564 = vpow2.f32 %v2421_v61  ;;  %v2422_v53 = vmul.f32 -1.442695, %v2225_v15  ;;  %v2423_v30 = vmul.f32 -1.442695, %v2227_v19 }
 0x7ce   : > { %2566 = vpow2.f32 %v2422_v53 }
 0x7cf   : > { %2568 = vpow2.f32 %v2423_v30 }
 0x7d9   : > { %v2565_v50 = vpop.eup %2564 }
 0x7da   : > { %v2231_v63 = vadd.f32 1.0, %v2565_v50 }
 0x7db   : > { %v2567_v59 = vpop.eup %2566 }
 0x7dc   : > { %2570 = vrcp.f32 %v2231_v63  ;;  %v2237_v52 = vadd.f32 1.0, %v2567_v59  ;;  %v2569_v31 = vpop.eup %2568 }
 0x7dd   : > { %2572 = vtanh.f32 %v2226_v55  ;;  %v2244_v35 = vadd.f32 1.0, %v2569_v31 }
 0x7de   : > { %2574 = vrcp.f32 %v2237_v52 }
 0x7df   : > { %2576 = vrcp.f32 %v2244_v35 }
 0x7e9   : > { %v2571_v32 = vpop.eup %2570 }
 0x7ea   : > { %v2573_v33 = vpop.eup %2572 }
 0x7eb   : > { %v2575_v34 = vpop.eup %2574  ;;  %v2248_v36 = vmul.f32 %v2573_v33, %v2571_v32 }
 0x7ec   : > { %v2247_v37 = vmul.f32 %v2575_v34, %v2002_v1  ;;  %v2577_v39 = vpop.eup %2576 }
 0x7ee   : > { %v2249_v38 = vadd.f32 %v2248_v36, %v2247_v37 }
 0x7f0   : > { %2578 = vtanh.f32 %v2249_v38 }
 0x7fd   : > { %v2579_v41 = vpop.eup %2578 }
 0x7fe   : > { %v2251_v42 = vmul.f32 %v2579_v41, %v2577_v39 }
 0x800   : > { %v2263_v43 = vsel %vm2258_vm15, %v2251_v42, 0.0 }
 0x801   : > { %2266 = vst [vmem:[%s2265_s28] sm:$0xff] %v2263_v43 }
 0x802 PF: > { %s13_s12 = sadd.s32 1, %s2586_s12  }
 0x803   : > { %p10_p5 = scmp.ge.s32.totalorder %s13_s12, 4  }
 0x805   :  { %12 = sbr.rel (!%p10_p5) target bundleno = 1 (0x1), region = 81 }

</bundles_post_ra>
